<compile_context>
chip_gen: v7x
topology: tpu7x:2x2x1
jax: 0.10.0
libtpu: 0.0.40
codegen_flags: <defaults>
</compile_context>

<pallas_src>
import functools
import math

import jax
import jax.numpy as jnp
from jax.experimental import pallas as pl
from jax.experimental.pallas import tpu as pltpu

MOMENTUM = 0.999     # m
TEMPERATURE = 0.2    # T
ALPHA = 1.0          # alpha


# ---------------------------------------------------------------------------
# Tiling helpers
# ---------------------------------------------------------------------------
def _round_up(n, m):
    return ((n + m - 1) // m) * m


def _device_kind():
    try:
        return jax.devices()[0].device_kind.lower()
    except Exception:
        return ""


def _vmem_limit_bytes():
    kind = _device_kind()
    if "v7" in kind:
        return 56 * 1024 * 1024      # 64 MiB physical -> leave headroom
    if "v5" in kind or "v6" in kind:
        return 100 * 1024 * 1024     # 128 MiB physical
    return 64 * 1024 * 1024


def _pick_tm(batch):
    # v5e MXU is 128x128 -> tm=128 is the native M; v6e/v7x MXUs are 256-wide.
    cap = 128 if "v5" in _device_kind() else 256
    if batch >= cap:
        return cap
    return _round_up(max(batch, 1), 8)


def _choose_k_tiling(num_genes, tk_target=2048):
    """Return (tk, padded_G); bounds the W1 VMEM block for any num_genes."""
    if num_genes <= tk_target:
        tk = _round_up(num_genes, 128)
        return tk, tk
    return tk_target, _round_up(num_genes, tk_target)


# ---------------------------------------------------------------------------
# Fused encoder kernels (dropout layers use p=0 -> identity)
# TODO(synk): train-mode dropout RNG not implemented (p=0 in this head).
# TODO(synk): optional int8 (v5e/v6e) / fp8 (v7x) W1 storage for the
#             HBM-bound weight stream is not implemented; bf16 is used.
# ---------------------------------------------------------------------------
def _encoder_feat_kernel(x_ref, w1_ref, b1_ref, w2_ref, b2_ref,
                         feat_ref, h1_acc):
    k = pl.program_id(1)

    @pl.when(k == 0)
    def _():
        h1_acc[...] = jnp.zeros_like(h1_acc)

    h1_acc[...] += jnp.dot(x_ref[...], w1_ref[...],
                           preferred_element_type=jnp.float32)

    @pl.when(k == pl.num_programs(1) - 1)
    def _():
        h1 = jnp.maximum(h1_acc[...] + b1_ref[...], 0.0)
        h2 = jnp.dot(h1.astype(jnp.bfloat16), w2_ref[...],
                     preferred_element_type=jnp.float32) + b2_ref[...]
        feat_ref[...] = jnp.maximum(h2, 0.0).astype(feat_ref.dtype)


def _encoder_full_kernel(x_ref, w1_ref, b1_ref, w2_ref, b2_ref, w3_ref, b3_ref,
                         feat_ref, out_ref, h1_acc):
    k = pl.program_id(1)

    @pl.when(k == 0)
    def _():
        h1_acc[...] = jnp.zeros_like(h1_acc)

    h1_acc[...] += jnp.dot(x_ref[...], w1_ref[...],
                           preferred_element_type=jnp.float32)

    @pl.when(k == pl.num_programs(1) - 1)
    def _():
        h1 = jnp.maximum(h1_acc[...] + b1_ref[...], 0.0)
        h2 = jnp.maximum(
            jnp.dot(h1.astype(jnp.bfloat16), w2_ref[...],
                    preferred_element_type=jnp.float32) + b2_ref[...], 0.0)
        feat_ref[...] = h2.astype(feat_ref.dtype)
        h3 = jnp.dot(h2.astype(jnp.bfloat16), w3_ref[...],
                     preferred_element_type=jnp.float32) + b3_ref[...]
        out_ref[...] = jnp.maximum(h3, 0.0)


def encoder_forward(x, params, *, with_head=False):
    """Fused Pallas forward of the base encoder.

    x: [B, G].  params: f32 master weights ((W1,b1),(W2,b2),(W3,b3)); W1 rows
    padded to the K-tiling, layer-2/3 outputs zero-padded to 128 lanes.
    Returns feat_padded [B, Hp] (bf16); with_head also returns out_padded
    [B, Cp] (f32).
    """
    (w1, b1), (w2, b2), (w3, b3) = params
    B, G = x.shape
    Gp, H1 = w1.shape
    Hp = w2.shape[1]
    Cp = w3.shape[1]

    tk, gp = _choose_k_tiling(G)
    assert gp == Gp, "params were initialised for a different num_genes"
    tm = _pick_tm(B)
    Bp = _round_up(B, tm)

    # Stream x in bf16 (halves its HBM read + VMEM block); pad batch & genes.
    xb = x.astype(jnp.bfloat16)
    if (Bp, Gp) != (B, G):
        xb = jnp.zeros((Bp, Gp), jnp.bfloat16).at[:B, :G].set(xb)

    # bf16 weights at the pallas_call boundary only; f32 masters stay outside.
    w1b = w1.astype(jnp.bfloat16)
    w2b = w2.astype(jnp.bfloat16)
    w3b = w3.astype(jnp.bfloat16)

    grid = (Bp // tm, Gp // tk)   # batch ("parallel") x K-reduction ("arbitrary")

    x_spec = pl.BlockSpec((tm, tk), lambda i, k: (i, k))
    w1_spec = pl.BlockSpec((tk, H1), lambda i, k: (k, 0))
    b1_spec = pl.BlockSpec((1, H1), lambda i, k: (0, 0))
    w2_spec = pl.BlockSpec((H1, Hp), lambda i, k: (0, 0))
    b2_spec = pl.BlockSpec((1, Hp), lambda i, k: (0, 0))
    feat_spec = pl.BlockSpec((tm, Hp), lambda i, k: (i, 0))

    flops = 2 * Bp * (Gp * H1 + H1 * Hp + (Hp * Cp if with_head else 0))
    bytes_accessed = int(
        xb.size * 2                               # x (bf16)
        + (Bp // tm) * Gp * H1 * 2                # W1 restreamed per batch tile
        + (H1 + Hp) * 4 + H1 * Hp * 2             # b1,b2,W2
        + Bp * Hp * 2                             # feat (bf16)
        + (int(with_head) * (Hp * Cp * 2 + Cp * 4 + Bp * Cp * 4)))

    compiler_params = pltpu.CompilerParams(
        dimension_semantics=("parallel", "arbitrary"),
        vmem_limit_bytes=_vmem_limit_bytes())
    cost = pl.CostEstimate(flops=flops, transcendentals=0,
                           bytes_accessed=bytes_accessed)
    scratch = [pltpu.VMEM((tm, H1), jnp.float32)]

    if with_head:
        w3_spec = pl.BlockSpec((Hp, Cp), lambda i, k: (0, 0))
        b3_spec = pl.BlockSpec((1, Cp), lambda i, k: (0, 0))
        out_spec = pl.BlockSpec((tm, Cp), lambda i, k: (i, 0))
        feat_p, out_p = pl.pallas_call(
            _encoder_full_kernel,
            out_shape=(jax.ShapeDtypeStruct((Bp, Hp), jnp.bfloat16),
                       jax.ShapeDtypeStruct((Bp, Cp), jnp.float32)),
            grid_spec=pltpu.PrefetchScalarGridSpec(
                num_scalar_prefetch=0, grid=grid,
                in_specs=[x_spec, w1_spec, b1_spec, w2_spec, b2_spec,
                          w3_spec, b3_spec],
                out_specs=[feat_spec, out_spec],
                scratch_shapes=scratch),
            compiler_params=compiler_params,
            cost_estimate=cost,
        )(xb, w1b, b1, w2b, b2, w3b, b3)
        return feat_p[:B], out_p[:B]

    feat_p = pl.pallas_call(
        _encoder_feat_kernel,
        out_shape=jax.ShapeDtypeStruct((Bp, Hp), jnp.bfloat16),
        grid_spec=pltpu.PrefetchScalarGridSpec(
            num_scalar_prefetch=0, grid=grid,
            in_specs=[x_spec, w1_spec, b1_spec, w2_spec, b2_spec],
            out_specs=feat_spec,
            scratch_shapes=scratch),
        compiler_params=compiler_params,
        cost_estimate=cost,
    )(xb, w1b, b1, w2b, b2)
    return feat_p[:B]


def encoder_reference(x, params, *, with_head=False):
    """Plain-XLA reference using the same bf16-at-the-boundary numerics."""
    (w1, b1), (w2, b2), (w3, b3) = params
    G = x.shape[1]
    xb = x.astype(jnp.bfloat16)
    h1 = jnp.maximum(jnp.dot(xb, w1[:G].astype(jnp.bfloat16),
                             preferred_element_type=jnp.float32) + b1, 0.0)
    h2 = jnp.maximum(jnp.dot(h1.astype(jnp.bfloat16), w2.astype(jnp.bfloat16),
                             preferred_element_type=jnp.float32) + b2, 0.0)
    feat = h2.astype(jnp.bfloat16)
    if not with_head:
        return feat
    h3 = jnp.maximum(jnp.dot(h2.astype(jnp.bfloat16), w3.astype(jnp.bfloat16),
                             preferred_element_type=jnp.float32) + b3, 0.0)
    return feat, h3


# ---------------------------------------------------------------------------
# Parameter init (f32 master copies) and COLCS forward (training + eval)
# ---------------------------------------------------------------------------
def init_encoder_params(key, num_genes, num_hiddens, num_clusters, h1=1024):
    """nn.Linear-style init; weights stored transposed (in, out) as f32 master
    copies (so the momentum EMA does not underflow), zero-padded:
    W1 rows -> K-tile multiple, layer-2/3 outputs -> 128 lanes."""
    _, gp = _choose_k_tiling(num_genes)
    hp = _round_up(num_hiddens, 128)
    cp = _round_up(num_clusters, 128)
    specs = [(num_genes, h1, gp, h1),
             (h1, num_hiddens, h1, hp),
             (num_hiddens, num_clusters, hp, cp)]
    params = []
    for fan_in, fan_out, pin, pout in specs:
        key, kw, kb = jax.random.split(key, 3)
        bound = 1.0 / math.sqrt(fan_in)
        w = jax.random.uniform(kw, (fan_in, fan_out), jnp.float32, -bound, bound)
        b = jax.random.uniform(kb, (fan_out,), jnp.float32, -bound, bound)
        w_pad = jnp.zeros((pin, pout), jnp.float32).at[:fan_in, :fan_out].set(w)
        b_pad = jnp.zeros((1, pout), jnp.float32).at[0, :fan_out].set(b)
        params.append((w_pad, b_pad))
    return tuple(params)


def _l2_normalize(x, eps=1e-12):
    n = jnp.sqrt(jnp.sum(x * x, axis=1, keepdims=True))
    return x / jnp.maximum(n, eps)


def _momentum_update(params_q, params_k):
    # f32 master weights: (1-m)=0.001 increments stay representable.
    return jax.tree_util.tree_map(
        lambda pk, pq_: MOMENTUM * pk + (1.0 - MOMENTUM) * pq_,
        params_k, params_q)


def _colcs_forward_impl(im_q, im_k, params_q, params_k, queue, queue_ptr,
                        cluster_layer, *, encoder_fn):
    batch = im_q.shape[0]
    dim = cluster_layer.shape[1]
    r = queue.shape[1]

    # momentum update of key encoder (torch: in-place under no_grad)
    params_k = _momentum_update(params_q, params_k)

    # key / query embeddings (feat-only encoder: classification head unused)
    k_feat = encoder_fn(im_k, params_k)
    k = _l2_normalize(k_feat[:, :dim].astype(jnp.float32))
    q_feat = encoder_fn(im_q, params_q)
    q = _l2_normalize(q_feat[:, :dim].astype(jnp.float32))

    # student-t soft cluster assignment
    diff = q[:, None, :] - cluster_layer[None, :, :]
    pq = 1.0 / (1.0 + jnp.sum(diff * diff, axis=2) / ALPHA)
    pq = pq ** ((ALPHA + 1.0) / 2.0)
    pq = pq / jnp.sum(pq, axis=1, keepdims=True)

    # contrastive logits
    l_pos = jnp.sum(q * k, axis=1, keepdims=True)
    l_neg = jnp.dot(q, queue)
    logits = jnp.concatenate([l_pos, l_neg], axis=1) / TEMPERATURE
    labels = jnp.zeros((batch,), dtype=jnp.int32)   # torch.long -> int32 on TPU

    # dequeue & enqueue (functional buffer update)
    ptr = queue_ptr[0]
    queue = jax.lax.dynamic_update_slice(queue, k.T.astype(queue.dtype), (0, ptr))
    queue_ptr = jnp.remainder(queue_ptr + batch, r)

    return (logits, labels, q, pq), (params_k, queue, queue_ptr)


def _encoder_pallas_feat(x, params):
    return encoder_forward(x, params, with_head=False)


def _encoder_ref_feat(x, params):
    return encoder_reference(x, params, with_head=False)


colcs_forward = jax.jit(
    functools.partial(_colcs_forward_impl, encoder_fn=_encoder_pallas_feat))
colcs_forward_reference = functools.partial(
    _colcs_forward_impl, encoder_fn=_encoder_ref_feat)


@functools.partial(jax.jit, static_argnames=("dim",))
def colcs_forward_eval(im, params_k, *, dim):
    feat = encoder_forward(im, params_k, with_head=False)
    return _l2_normalize(feat[:, :dim].astype(jnp.float32))


if __name__ == "__main__":
    batch = 4
    num_genes = 512        # small demo (COLCS default: 10000)
    dim = 16               # COLCS `dim` == encoder num_hiddens
    num_clusters = 16      # width of the encoder's classification head
    n = 6                  # COLCS `n`: rows of cluster_layer
    r = 512                # queue length (r % batch == 0, as torch asserts)
    assert r % batch == 0

    key = jax.random.PRNGKey(0)
    k_imq, k_imk, k_par, k_que, k_clu = jax.random.split(key, 5)
    im_q = jax.random.normal(k_imq, (batch, num_genes), jnp.float32)
    im_k = jax.random.normal(k_imk, (batch, num_genes), jnp.float32)

    params_q = init_encoder_params(k_par, num_genes, dim, num_clusters)
    params_k = jax.tree_util.tree_map(lambda p: p, params_q)   # copy_ of q

    queue = jax.random.normal(k_que, (dim, r), jnp.float32)
    queue = queue / jnp.linalg.norm(queue, axis=0, keepdims=True)
    queue_ptr = jnp.zeros((1,), jnp.int32)
    cluster_layer = math.sqrt(2.0 / (n + dim)) * jax.random.normal(
        k_clu, (n, dim), jnp.float32)                            # xavier_normal_

    # --- fused Pallas encoder (with head) vs. plain-XLA reference ---
    enc_full = jax.jit(functools.partial(encoder_forward, with_head=True))
    feat_p, out_p = enc_full(im_q, params_q)
    jax.block_until_ready((feat_p, out_p))
    feat_r, out_r = encoder_reference(im_q, params_q, with_head=True)
    assert feat_p.shape[0] == batch and out_p.shape[0] == batch
    assert jnp.allclose(feat_p.astype(jnp.float32), feat_r.astype(jnp.float32),
                        atol=2e-2, rtol=2e-2)
    assert jnp.allclose(out_p, out_r, atol=2e-2, rtol=2e-2)

    # --- full COLCS training forward (feat-only Pallas encoder) ---
    (logits, labels, q, pq), (params_k_new, queue_new, ptr_new) = colcs_forward(
        im_q, im_k, params_q, params_k, queue, queue_ptr, cluster_layer)
    jax.block_until_ready((logits, labels, q, pq, queue_new, ptr_new))

    (logits_r, labels_r, q_r, pq_r), (_, queue_ref, ptr_ref) = \
        colcs_forward_reference(im_q, im_k, params_q, params_k, queue,
                                queue_ptr, cluster_layer)

    assert logits.shape == (batch, 1 + r)
    assert labels.shape == (batch,)
    assert q.shape == (batch, dim)
    assert pq.shape == (batch, n)
    assert jnp.allclose(q, q_r, atol=2e-2, rtol=2e-2)
    assert jnp.allclose(pq, pq_r, atol=2e-2, rtol=2e-2)
    assert jnp.allclose(logits, logits_r, atol=5e-2, rtol=5e-2)
    assert jnp.allclose(queue_new, queue_ref, atol=2e-2, rtol=2e-2)
    assert int(ptr_new[0]) == batch % r
    assert bool(jnp.all(labels == 0))

    # --- eval path: k = normalize(encoder_k(im_q)) ---
    k_eval = colcs_forward_eval(im_q, params_k_new, dim=dim)
    jax.block_until_ready(k_eval)
    assert k_eval.shape == (batch, dim)

    print("KERNEL_OK")
</pallas_src>

<mosaic_0001>
module attributes {stable_mosaic.version = 11 : i64} {
  func.func @_encoder_full_kernel(%arg0: i32, %arg1: i32, %arg2: memref<8x512xbf16, #tpu.memory_space<vmem>>, %arg3: memref<512x1024xbf16, #tpu.memory_space<vmem>>, %arg4: memref<1x1024xf32, #tpu.memory_space<vmem>>, %arg5: memref<1024x128xbf16, #tpu.memory_space<vmem>>, %arg6: memref<1x128xf32, #tpu.memory_space<vmem>>, %arg7: memref<128x128xbf16, #tpu.memory_space<vmem>>, %arg8: memref<1x128xf32, #tpu.memory_space<vmem>>, %arg9: memref<8x128xbf16, #tpu.memory_space<vmem>>, %arg10: memref<8x128xf32, #tpu.memory_space<vmem>>, %arg11: memref<8x1024xf32, #tpu.memory_space<vmem>>) attributes {dimension_semantics = [#tpu.dimension_semantics<parallel>, #tpu.dimension_semantics<arbitrary>], iteration_bounds = array<i64: 1, 1>, scalar_prefetch = 0 : i64, scratch_operands = 1 : i64, tpu.core_type = #tpu.core_type<tc>, window_params = [{transform_indices = @transform_0, window_bounds = array<i64: 8, 512>}, {transform_indices = @transform_1, window_bounds = array<i64: 512, 1024>}, {pipeline_mode = #tpu.pipeline_mode<synchronous>, transform_indices = @transform_2, window_bounds = array<i64: 1, 1024>}, {pipeline_mode = #tpu.pipeline_mode<synchronous>, transform_indices = @transform_3, window_bounds = array<i64: 1024, 128>}, {pipeline_mode = #tpu.pipeline_mode<synchronous>, transform_indices = @transform_4, window_bounds = array<i64: 1, 128>}, {pipeline_mode = #tpu.pipeline_mode<synchronous>, transform_indices = @transform_5, window_bounds = array<i64: 128, 128>}, {pipeline_mode = #tpu.pipeline_mode<synchronous>, transform_indices = @transform_6, window_bounds = array<i64: 1, 128>}, {transform_indices = @transform_7, window_bounds = array<i64: 8, 128>}, {transform_indices = @transform_8, window_bounds = array<i64: 8, 128>}]} {
    %c0_i32 = arith.constant 0 : i32
    %0 = arith.cmpi eq, %arg1, %c0_i32 : i32
    %1 = arith.extui %0 : i1 to i32
    %c0_i32_0 = arith.constant 0 : i32
    %2 = arith.cmpi ne, %1, %c0_i32_0 : i32
    scf.if %2 {
      %cst_10 = arith.constant 0.000000e+00 : f32
      %12 = vector.broadcast %cst_10 : f32 to vector<8x1024xf32>
      %c0_11 = arith.constant 0 : index
      %c0_12 = arith.constant 0 : index
      %13 = vector.load %arg11[%c0_11, %c0_12] : memref<8x1024xf32, #tpu.memory_space<vmem>>, vector<8x1024xf32>
      tpu.vector_store %arg11[%c0_11, %c0_12], %12 {strides = array<i32>} : memref<8x1024xf32, #tpu.memory_space<vmem>>, vector<8x1024xf32>,
    } else {
    }
    %c0 = arith.constant 0 : index
    %c0_1 = arith.constant 0 : index
    %3 = vector.load %arg11[%c0, %c0_1] : memref<8x1024xf32, #tpu.memory_space<vmem>>, vector<8x1024xf32>
    %c0_2 = arith.constant 0 : index
    %c0_3 = arith.constant 0 : index
    %4 = vector.load %arg2[%c0_2, %c0_3] : memref<8x512xbf16, #tpu.memory_space<vmem>>, vector<8x512xbf16>
    %c0_4 = arith.constant 0 : index
    %c0_5 = arith.constant 0 : index
    %5 = vector.load %arg3[%c0_4, %c0_5] : memref<512x1024xbf16, #tpu.memory_space<vmem>>, vector<512x1024xbf16>
    %cst = arith.constant dense<0.000000e+00> : vector<8x1024xf32>
    %6 = tpu.matmul %4, %5, %cst {dimension_numbers = #tpu.dot_dimension_numbers<[1], [0], [0], [1], [0, 0, 1, 1], [], []>} : vector<8x512xbf16>, vector<512x1024xbf16>, vector<8x1024xf32> -> vector<8x1024xf32>
    %7 = arith.addf %3, %6 : vector<8x1024xf32>
    %c0_6 = arith.constant 0 : index
    %c0_7 = arith.constant 0 : index
    %8 = vector.load %arg11[%c0_6, %c0_7] : memref<8x1024xf32, #tpu.memory_space<vmem>>, vector<8x1024xf32>
    tpu.vector_store %arg11[%c0_6, %c0_7], %7 {strides = array<i32>} : memref<8x1024xf32, #tpu.memory_space<vmem>>, vector<8x1024xf32>,
    %c0_i32_8 = arith.constant 0 : i32
    %9 = arith.cmpi eq, %arg1, %c0_i32_8 : i32
    %10 = arith.extui %9 : i1 to i32
    %c0_i32_9 = arith.constant 0 : i32
    %11 = arith.cmpi ne, %10, %c0_i32_9 : i32
    scf.if %11 {
      %c0_10 = arith.constant 0 : index
      %c0_11 = arith.constant 0 : index
      %12 = vector.load %arg11[%c0_10, %c0_11] : memref<8x1024xf32, #tpu.memory_space<vmem>>, vector<8x1024xf32>
      %c0_12 = arith.constant 0 : index
      %c0_13 = arith.constant 0 : index
      %13 = vector.load %arg4[%c0_12, %c0_13] : memref<1x1024xf32, #tpu.memory_space<vmem>>, vector<1x1024xf32>
      %14 = vector.broadcast %13 : vector<1x1024xf32> to vector<8x1024xf32>
      %15 = arith.addf %12, %14 : vector<8x1024xf32>
      %cst_14 = arith.constant 0.000000e+00 : f32
      %16 = vector.broadcast %cst_14 : f32 to vector<8x1024xf32>
      %17 = arith.maximumf %15, %16 : vector<8x1024xf32>
      %18 = arith.truncf %17 : vector<8x1024xf32> to vector<8x1024xbf16>
      %c0_15 = arith.constant 0 : index
      %c0_16 = arith.constant 0 : index
      %19 = vector.load %arg5[%c0_15, %c0_16] : memref<1024x128xbf16, #tpu.memory_space<vmem>>, vector<1024x128xbf16>
      %cst_17 = arith.constant dense<0.000000e+00> : vector<8x128xf32>
      %20 = tpu.matmul %18, %19, %cst_17 {dimension_numbers = #tpu.dot_dimension_numbers<[1], [0], [0], [1], [0, 0, 1, 1], [], []>} : vector<8x1024xbf16>, vector<1024x128xbf16>, vector<8x128xf32> -> vector<8x128xf32>
      %c0_18 = arith.constant 0 : index
      %c0_19 = arith.constant 0 : index
      %21 = vector.load %arg6[%c0_18, %c0_19] : memref<1x128xf32, #tpu.memory_space<vmem>>, vector<1x128xf32>
      %22 = vector.broadcast %21 : vector<1x128xf32> to vector<8x128xf32>
      %23 = arith.addf %20, %22 : vector<8x128xf32>
      %cst_20 = arith.constant 0.000000e+00 : f32
      %24 = vector.broadcast %cst_20 : f32 to vector<8x128xf32>
      %25 = arith.maximumf %23, %24 : vector<8x128xf32>
      %26 = arith.truncf %25 : vector<8x128xf32> to vector<8x128xbf16>
      %c0_21 = arith.constant 0 : index
      %c0_22 = arith.constant 0 : index
      %27 = vector.load %arg9[%c0_21, %c0_22] : memref<8x128xbf16, #tpu.memory_space<vmem>>, vector<8x128xbf16>
      tpu.vector_store %arg9[%c0_21, %c0_22], %26 {strides = array<i32>} : memref<8x128xbf16, #tpu.memory_space<vmem>>, vector<8x128xbf16>,
      %28 = arith.truncf %25 : vector<8x128xf32> to vector<8x128xbf16>
      %c0_23 = arith.constant 0 : index
      %c0_24 = arith.constant 0 : index
      %29 = vector.load %arg7[%c0_23, %c0_24] : memref<128x128xbf16, #tpu.memory_space<vmem>>, vector<128x128xbf16>
      %cst_25 = arith.constant dense<0.000000e+00> : vector<8x128xf32>
      %30 = tpu.matmul %28, %29, %cst_25 {dimension_numbers = #tpu.dot_dimension_numbers<[1], [0], [0], [1], [0, 0, 1, 1], [], []>} : vector<8x128xbf16>, vector<128x128xbf16>, vector<8x128xf32> -> vector<8x128xf32>
      %c0_26 = arith.constant 0 : index
      %c0_27 = arith.constant 0 : index
      %31 = vector.load %arg8[%c0_26, %c0_27] : memref<1x128xf32, #tpu.memory_space<vmem>>, vector<1x128xf32>
      %32 = vector.broadcast %31 : vector<1x128xf32> to vector<8x128xf32>
      %33 = arith.addf %30, %32 : vector<8x128xf32>
      %cst_28 = arith.constant 0.000000e+00 : f32
      %34 = vector.broadcast %cst_28 : f32 to vector<8x128xf32>
      %35 = arith.maximumf %33, %34 : vector<8x128xf32>
      %c0_29 = arith.constant 0 : index
      %c0_30 = arith.constant 0 : index
      %36 = vector.load %arg10[%c0_29, %c0_30] : memref<8x128xf32, #tpu.memory_space<vmem>>, vector<8x128xf32>
      tpu.vector_store %arg10[%c0_29, %c0_30], %35 {strides = array<i32>} : memref<8x128xf32, #tpu.memory_space<vmem>>, vector<8x128xf32>,
    } else {
    }
    return
  }
  func.func @transform_0(%arg0: i32, %arg1: i32) -> (i32, i32) {
    %c0_i32 = arith.constant 0 : i32
    return %arg0, %arg1 : i32, i32
  }
  func.func @transform_1(%arg0: i32, %arg1: i32) -> (i32, i32) {
    %c0_i32 = arith.constant 0 : i32
    %c0_i32_0 = arith.constant 0 : i32
    return %arg1, %c0_i32 : i32, i32
  }
  func.func @transform_2(%arg0: i32, %arg1: i32) -> (i32, i32) {
    %c0_i32 = arith.constant 0 : i32
    %c0_i32_0 = arith.constant 0 : i32
    %c0_i32_1 = arith.constant 0 : i32
    return %c0_i32, %c0_i32_0 : i32, i32
  }
  func.func @transform_3(%arg0: i32, %arg1: i32) -> (i32, i32) {
    %c0_i32 = arith.constant 0 : i32
    %c0_i32_0 = arith.constant 0 : i32
    %c0_i32_1 = arith.constant 0 : i32
    return %c0_i32, %c0_i32_0 : i32, i32
  }
  func.func @transform_4(%arg0: i32, %arg1: i32) -> (i32, i32) {
    %c0_i32 = arith.constant 0 : i32
    %c0_i32_0 = arith.constant 0 : i32
    %c0_i32_1 = arith.constant 0 : i32
    return %c0_i32, %c0_i32_0 : i32, i32
  }
  func.func @transform_5(%arg0: i32, %arg1: i32) -> (i32, i32) {
    %c0_i32 = arith.constant 0 : i32
    %c0_i32_0 = arith.constant 0 : i32
    %c0_i32_1 = arith.constant 0 : i32
    return %c0_i32, %c0_i32_0 : i32, i32
  }
  func.func @transform_6(%arg0: i32, %arg1: i32) -> (i32, i32) {
    %c0_i32 = arith.constant 0 : i32
    %c0_i32_0 = arith.constant 0 : i32
    %c0_i32_1 = arith.constant 0 : i32
    return %c0_i32, %c0_i32_0 : i32, i32
  }
  func.func @transform_7(%arg0: i32, %arg1: i32) -> (i32, i32) {
    %c0_i32 = arith.constant 0 : i32
    %c0_i32_0 = arith.constant 0 : i32
    return %arg0, %c0_i32 : i32, i32
  }
  func.func @transform_8(%arg0: i32, %arg1: i32) -> (i32, i32) {
    %c0_i32 = arith.constant 0 : i32
    %c0_i32_0 = arith.constant 0 : i32
    return %arg0, %c0_i32 : i32, i32
  }
}

</mosaic_0001>

<bundles_post_ra>
// kernel: encoder_forward.1
= control target key start
LH: loop header
LB: loop body
LE: loop exit
PB: predicated region body
PF: predicated region fallthrough
CT: control target
= control target key end

     0   :  { %14 = vsyncpa [#allocation4], 0  ;;  %s3914_s0 = inlined_call_operand.hbm [shape: bf16[8,512], index: 0, kind: input, shape index: {}]   ;;  %s3915_s1 = inlined_call_operand.hbm [shape: bf16[512,1024], index: 1, kind: input, shape index: {}]   ;;  %s3916_s2 = inlined_call_operand.hbm [shape: f32[1,1024], index: 2, kind: input, shape index: {}]   ;;  %s3917_s3 = inlined_call_operand.hbm [shape: bf16[1024,128], index: 3, kind: input, shape index: {}]   ;;  %s3918_s4 = inlined_call_operand.hbm [shape: f32[1,128], index: 4, kind: input, shape index: {}]   ;;  %s3919_s5 = inlined_call_operand.hbm [shape: bf16[128,128], index: 5, kind: input, shape index: {}]   ;;  %s3920_s6 = inlined_call_operand.hbm [shape: f32[1,128], index: 6, kind: input, shape index: {}]   ;;  %s3921_s7 = inlined_call_operand.hbm [shape: bf16[8,128], index: 7, kind: output, shape index: {0}]   ;;  %s3922_s8 = inlined_call_operand.hbm [shape: f32[8,128], index: 8, kind: output, shape index: {1}]  }
   0x1   :  { %15 = vsyncpa [#allocation7], 0 }
   0x2   :  { %16 = vsyncpa [#allocation10], 0 }
   0x3   :  { %17 = vsyncpa [#allocation13], 0 }
   0x4   :  { %18 = vsyncpa [#allocation5], 0 }
   0x5   :  { %19 = vsyncpa [#allocation17], 0  ;;  %s3690_s27 = smov [#allocation6]   ;;  %s3480_s9 = scalar_lea.hbm %s3915_s1, 32768 }
   0x6   :  { %s35_s28 = sshll.u32 %s3690_s27, 4  ;;  %p3481_p0 = scmp.ne.s32.totalorder %s3915_s1, %s3480_s9  ;;  %s36_s28 = int_to_ptr.vmem [resolvable:$true] %s35_s28 }
   0x7   :  { %p3484_p1 = scmp.lt.u32.totalorder %s3480_s9, %s3915_s1 }
   0x9   :  { %p3486_p2 = pnand %p3484_p1, %p3481_p0 }
   0xb   :  { %3489 = shalt.err (!%p3486_p2)
}
   0xc   :  { %s3490_s14 = scalar_lea.vmem %s36_s28, 32768  ;;  %p3495_p4 = scmp.lt.s32.totalorder %s36_s28, %s36_s28 }
   0xd   :  { %p3491_p3 = scmp.ne.s32.totalorder %s36_s28, %s3490_s14  ;;  %p3496_p5 = scmp.lt.s32.totalorder %s3490_s14, %s3490_s14 }
   0xf   :  { %p3497_p6 = por %p3496_p5, %p3495_p4 }
  0x11   :  { %p3498_p7 = pnand %p3497_p6, %p3491_p3 }
  0x13   :  { %3501 = shalt.err (!%p3498_p7)
}
  0x14   :  { %s3691_s15 = smov 512   ;;  %s3692_s16 = smov 32  }
  0x15   :  { %41 = dma.hbm_to_vmem [thread:$0]  %s3915_s1, 32768, %s36_s28, [#allocation7], %s3691_s15, %s3691_s15, %s3692_s16  }
  0x16   :  { %s3693_s19 = smov [#allocation9]   ;;  %s3502_s23 = scalar_lea.hbm %s3917_s3, 8192 }
  0x17   :  { %s57_s20 = sshll.u32 %s3693_s19, 4  ;;  %p3503_p8 = scmp.ne.s32.totalorder %s3917_s3, %s3502_s23  ;;  %s58_s20 = int_to_ptr.vmem [resolvable:$true] %s57_s20 }
  0x18   :  { %p3506_p9 = scmp.lt.u32.totalorder %s3502_s23, %s3917_s3 }
  0x1a   :  { %p3508_p10 = pnand %p3506_p9, %p3503_p8 }
  0x1c   :  { %3511 = shalt.err (!%p3508_p10)
}
  0x1d   :  { %s3512_s29 = scalar_lea.vmem %s58_s20, 8192  ;;  %p3517_p12 = scmp.lt.s32.totalorder %s58_s20, %s58_s20 }
  0x1e   :  { %p3513_p11 = scmp.ne.s32.totalorder %s58_s20, %s3512_s29  ;;  %p3518_p13 = scmp.lt.s32.totalorder %s3512_s29, %s3512_s29 }
  0x20   :  { %p3519_p0 = por %p3518_p13, %p3517_p12 }
  0x22   :  { %p3520_p1 = pnand %p3519_p0, %p3513_p11 }
  0x24   :  { %3523 = shalt.err (!%p3520_p1)
}
  0x25   :  { %s3694_s1 = smov 64   ;;  %s3695_s28 = smov 4  }
  0x26   :  { %63 = dma.hbm_to_vmem [thread:$0]  %s3917_s3, 8192, %s58_s20, [#allocation10], %s3694_s1, %s3694_s1, %s3695_s28  }
  0x27   :  { %s3696_s10 = smov [#allocation12]   ;;  %s3697_s12 = smov [#allocation3]  }
  0x28   :  { %s79_s11 = sshll.u32 %s3696_s10, 4  ;;  %s26_s13 = sshll.u32 %s3697_s12, 4  ;;  %s80_s11 = int_to_ptr.vmem [resolvable:$true] %s79_s11  ;;  %s27_s13 = int_to_ptr.vmem [resolvable:$true] %s26_s13 }
  0x29   :  { %s3524_s16 = scalar_lea.hbm %s3919_s5, 1024 }
  0x2a   :  { %p3525_p2 = scmp.ne.s32.totalorder %s3919_s5, %s3524_s16  ;;  %p3528_p3 = scmp.lt.u32.totalorder %s3524_s16, %s3919_s5 }
  0x2c   :  { %p3530_p4 = pnand %p3528_p3, %p3525_p2 }
  0x2e   :  { %3533 = shalt.err (!%p3530_p4)
}
  0x2f   :  { %s3534_s3 = scalar_lea.vmem %s80_s11, 1024  ;;  %p3539_p6 = scmp.lt.s32.totalorder %s80_s11, %s80_s11 }
  0x30   :  { %p3535_p5 = scmp.ne.s32.totalorder %s80_s11, %s3534_s3  ;;  %p3540_p7 = scmp.lt.s32.totalorder %s3534_s3, %s3534_s3 }
  0x32   :  { %p3541_p8 = por %p3540_p7, %p3539_p6 }
  0x34   :  { %p3542_p9 = pnand %p3541_p8, %p3535_p5 }
  0x36   :  { %3545 = shalt.err (!%p3542_p9)
}
  0x37   :  { %85 = dma.hbm_to_vmem [thread:$0]  %s3919_s5, 1024, %s80_s11, [#allocation13], %s3694_s1, %s3694_s1, %s3695_s28  }
  0x38   :  { %s3546_s25 = scalar_lea.hbm %s3914_s0, 256 }
  0x39   :  { %p3547_p10 = scmp.ne.s32.totalorder %s3914_s0, %s3546_s25  ;;  %p3550_p11 = scmp.lt.u32.totalorder %s3546_s25, %s3914_s0 }
  0x3b   :  { %p3552_p12 = pnand %p3550_p11, %p3547_p10 }
  0x3d   :  { %3555 = shalt.err (!%p3552_p12)
}
  0x3e   :  { %s3556_s9 = scalar_lea.vmem %s27_s13, 256  ;;  %p3561_p0 = scmp.lt.s32.totalorder %s27_s13, %s27_s13 }
  0x3f   :  { %p3557_p13 = scmp.ne.s32.totalorder %s27_s13, %s3556_s9  ;;  %p3562_p1 = scmp.lt.s32.totalorder %s3556_s9, %s3556_s9 }
  0x41   :  { %p3563_p2 = por %p3562_p1, %p3561_p0 }
  0x43   :  { %p3564_p3 = pnand %p3563_p2, %p3557_p13 }
  0x45   :  { %3567 = shalt.err (!%p3564_p3)
}
  0x46   :  { %29 = dma.hbm_to_vmem [thread:$0]  %s3914_s0, 256, %s27_s13, [#allocation4]  }
  0x47   :  { %s3698_s28 = smov [#allocation8]   ;;  %s3699_s11 = smov [#allocation11]  }
  0x48   :  { %s48_s10 = sshll.u32 %s3698_s28, 4  ;;  %s70_s12 = sshll.u32 %s3699_s11, 4  ;;  %s49_s10 = int_to_ptr.vmem [resolvable:$true] %s48_s10  ;;  %s71_s12 = int_to_ptr.vmem [resolvable:$true] %s70_s12 }
  0x49   :  { %s3568_s16 = scalar_lea.hbm %s3916_s2, 128 }
  0x4a   :  { %p3569_p4 = scmp.ne.s32.totalorder %s3916_s2, %s3568_s16  ;;  %p3572_p5 = scmp.lt.u32.totalorder %s3568_s16, %s3916_s2 }
  0x4c   :  { %p3574_p6 = pnand %p3572_p5, %p3569_p4 }
  0x4e   :  { %3577 = shalt.err (!%p3574_p6)
}
  0x4f   :  { %s3578_s0 = scalar_lea.vmem %s49_s10, 128  ;;  %p3583_p8 = scmp.lt.s32.totalorder %s49_s10, %s49_s10 }
  0x50   :  { %p3579_p7 = scmp.ne.s32.totalorder %s49_s10, %s3578_s0  ;;  %p3584_p9 = scmp.lt.s32.totalorder %s3578_s0, %s3578_s0 }
  0x52   :  { %p3585_p10 = por %p3584_p9, %p3583_p8 }
  0x54   :  { %p3586_p11 = pnand %p3585_p10, %p3579_p7 }
  0x56   :  { %3589 = shalt.err (!%p3586_p11)
}
  0x57   :  { %51 = dma.hbm_to_vmem [thread:$0]  %s3916_s2, 128, %s49_s10, [#allocation7]  }
  0x58   :  { %s3590_s23 = scalar_lea.hbm %s3918_s4, 16 }
  0x59   :  { %p3591_p12 = scmp.ne.s32.totalorder %s3918_s4, %s3590_s23  ;;  %p3594_p13 = scmp.lt.u32.totalorder %s3590_s23, %s3918_s4 }
  0x5b   :  { %p3596_p0 = pnand %p3594_p13, %p3591_p12 }
  0x5d   :  { %3599 = shalt.err (!%p3596_p0)
}
  0x5e   :  { %s3600_s29 = scalar_lea.vmem %s71_s12, 16  ;;  %s3604_s30 = scalar_lea.vmem %s71_s12, 32 }
  0x5f   :  { %p3601_p1 = scmp.ne.s32.totalorder %s71_s12, %s3600_s29  ;;  %p3605_p2 = scmp.lt.s32.totalorder %s71_s12, %s71_s12 }
  0x60   :  { %p3606_p3 = scmp.lt.s32.totalorder %s3604_s30, %s3600_s29 }
  0x62   :  { %p3607_p4 = por %p3606_p3, %p3605_p2 }
  0x64   :  { %p3608_p5 = pnand %p3607_p4, %p3601_p1 }
  0x66   :  { %3611 = shalt.err (!%p3608_p5)
}
  0x67   :  { %73 = dma.hbm_to_vmem [thread:$0]  %s3918_s4, 16, %s71_s12, [#allocation10]  }
  0x68   :  { %s3700_s5 = smov [#allocation14]   ;;  %s3612_s11 = scalar_lea.hbm %s3920_s6, 16 }
  0x69   :  { %s92_s1 = sshll.u32 %s3700_s5, 4  ;;  %p3613_p6 = scmp.ne.s32.totalorder %s3920_s6, %s3612_s11  ;;  %s93_s1 = int_to_ptr.vmem [resolvable:$true] %s92_s1 }
  0x6a   :  { %p3616_p7 = scmp.lt.u32.totalorder %s3612_s11, %s3920_s6 }
  0x6c   :  { %p3618_p8 = pnand %p3616_p7, %p3613_p6 }
  0x6e   :  { %3621 = shalt.err (!%p3618_p8)
}
  0x6f   :  { %s3622_s18 = scalar_lea.vmem %s93_s1, 16  ;;  %s3626_s4 = scalar_lea.vmem %s93_s1, 32 }
  0x70   :  { %p3623_p9 = scmp.ne.s32.totalorder %s93_s1, %s3622_s18  ;;  %p3627_p10 = scmp.lt.s32.totalorder %s93_s1, %s93_s1 }
  0x71   :  { %p3628_p11 = scmp.lt.s32.totalorder %s3626_s4, %s3622_s18 }
  0x73   :  { %p3629_p12 = por %p3628_p11, %p3627_p10 }
  0x75   :  { %p3630_p13 = pnand %p3629_p12, %p3623_p9 }
  0x77   :  { %3633 = shalt.err (!%p3630_p13)
}
  0x78   :  { %95 = dma.hbm_to_vmem [thread:$0]  %s3920_s6, 16, %s93_s1, [#allocation13]  }
  0x79   :  { %3678 = dma.done.wait [#allocation4], 256  }
  0x7a   :  { %3679 = vsyncadd [#allocation4], 4294967040 }
  0x7b   :  { %3680 = dma.done.wait [#allocation7], 32896  }
  0x7c   :  { %3681 = vsyncadd [#allocation7], 4294934400 }
  0x7d   :  { %3682 = dma.done.wait [#allocation10], 8208  }
  0x7e   :  { %3683 = vsyncadd [#allocation10], 4294959088 }
  0x7f   :  { %3684 = dma.done.wait [#allocation13], 1040  }
  0x80   :  { %3685 = vsyncadd [#allocation13], 4294966256  ;;  %v140_v0 = vld [vmem:[#allocation6] sm:$0xff]  ;;  %v3834_v53 = vld [vmem:[#allocation3] sm:$0xff]  ;;  %vm3702_vm0 = vmmov 0   ;;  %s3703_s6 = smov [#allocation15]  }
  0x81   :  { %v144_v1 = vld [vmem:[#allocation6 + $0x20] sm:$0xff]  ;;  %v3836_v54 = vld [vmem:[#allocation3 + $0x8] sm:$0xff]  ;;  %v3840_v58 = vcombine.high %v3834_v53, %v3834_v53  ;;  %s2912_s21 = sshll.u32 %s3703_s6, 4  ;;  %s2913_s21 = int_to_ptr.vmem [resolvable:$true] %s2912_s21 }
  0x82   :  { %v268_v2 = vld [vmem:[#allocation6 + $0x400] sm:$0xff]  ;;  %v2943_v3 = vcombine.high %v140_v0, %v144_v1  ;;  %v2942_v5 = vcombine.low %v140_v0, %v144_v1  ;;  %v3844_v59 = vcombine.high %v3836_v54, %v3836_v54  ;;  %s3634_s0 = scalar_lea.vmem %s2913_s21, 64  ;;  %p3639_p1 = scmp.lt.s32.totalorder %s2913_s21, %s2913_s21 }
  0x83   :  { %v272_v4 = vld [vmem:[#allocation6 + $0x420] sm:$0xff]  ;;  %1722 = vmatprep.mubr.bf16.mxu0 %v3840_v58  ;;  %p3635_p0 = scmp.ne.s32.totalorder %s2913_s21, %s3634_s0  ;;  %p3640_p2 = scmp.lt.s32.totalorder %s3634_s0, %s3634_s0 }
  0x84   :  { %v148_v6 = vld [vmem:[#allocation6 + $0x40] sm:$0xff]  ;;  %v3071_v8 = vcombine.high %v268_v2, %v272_v4  ;;  %v3070_v9 = vcombine.low %v268_v2, %v272_v4  ;;  %1690 = vmatprep.subr.bf16.mxu0 %v2943_v3  ;;  %1763 = vmatprep.mubr.bf16.mxu1 %v3844_v59 }
  0x85   :  { %v152_v7 = vld [vmem:[#allocation6 + $0x60] sm:$0xff]  ;;  %1691 = vmatpush1.bf16.msra.mxu0 %v2942_v5  ;;  %p3641_p3 = por %p3640_p2, %p3639_p1 }
  0x86   :  { %v2951_v10 = vcombine.high %v148_v6, %v152_v7  ;;  %v276_v11 = vld [vmem:[#allocation6 + $0x440] sm:$0xff]  ;;  %1731 = vmatprep.subr.bf16.mxu1 %v3071_v8  ;;  %v2950_v18 = vcombine.low %v148_v6, %v152_v7 }
  0x87   :  { %v280_v12 = vld [vmem:[#allocation6 + $0x460] sm:$0xff]  ;;  %1732 = vmatpush1.bf16.msra.mxu1 %v3070_v9  ;;  %p3642_p4 = pnand %p3641_p3, %p3635_p0 }
  0x88   :  { %v156_v13 = vld [vmem:[#allocation6 + $0x80] sm:$0xff]  ;;  %v3079_v14 = vcombine.high %v276_v11, %v280_v12  ;;  %1692 = vmatprep.subr.bf16.mxu0 %v2951_v10  ;;  %v3078_v19 = vcombine.low %v276_v11, %v280_v12 }
  0x89   :  { %v160_v15 = vld [vmem:[#allocation6 + $0xa0] sm:$0xff]  ;;  %1693 = vmatpush1.bf16.msra.mxu0 %v2950_v18 }
  0x8a   :  { %v284_v16 = vld [vmem:[#allocation6 + $0x480] sm:$0xff]  ;;  %v2959_v20 = vcombine.high %v156_v13, %v160_v15  ;;  %1733 = vmatprep.subr.bf16.mxu1 %v3079_v14  ;;  %v2958_v26 = vcombine.low %v156_v13, %v160_v15 }
  0x8b   :  { %v288_v17 = vld [vmem:[#allocation6 + $0x4a0] sm:$0xff]  ;;  %1734 = vmatpush1.bf16.msra.mxu1 %v3078_v19 }
  0x8c   :  { %v3087_v21 = vcombine.high %v284_v16, %v288_v17  ;;  %v164_v22 = vld [vmem:[#allocation6 + $0xc0] sm:$0xff]  ;;  %1694 = vmatprep.subr.bf16.mxu0 %v2959_v20  ;;  %v3086_v27 = vcombine.low %v284_v16, %v288_v17 }
  0x8d   :  { %v168_v23 = vld [vmem:[#allocation6 + $0xe0] sm:$0xff]  ;;  %1695 = vmatpush1.bf16.msra.mxu0 %v2958_v26 }
  0x8e   :  { %v292_v24 = vld [vmem:[#allocation6 + $0x4c0] sm:$0xff]  ;;  %v2967_v28 = vcombine.high %v164_v22, %v168_v23  ;;  %1735 = vmatprep.subr.bf16.mxu1 %v3087_v21  ;;  %v2966_v34 = vcombine.low %v164_v22, %v168_v23 }
  0x8f   :  { %v296_v25 = vld [vmem:[#allocation6 + $0x4e0] sm:$0xff]  ;;  %1736 = vmatpush1.bf16.msra.mxu1 %v3086_v27 }
  0x90   :  { %v3095_v29 = vcombine.high %v292_v24, %v296_v25  ;;  %v172_v30 = vld [vmem:[#allocation6 + $0x100] sm:$0xff]  ;;  %1696 = vmatprep.subr.bf16.mxu0 %v2967_v28  ;;  %v3094_v35 = vcombine.low %v292_v24, %v296_v25 }
  0x91   :  { %v176_v31 = vld [vmem:[#allocation6 + $0x120] sm:$0xff]  ;;  %1697 = vmatpush1.bf16.msra.mxu0 %v2966_v34 }
  0x92   :  { %v300_v32 = vld [vmem:[#allocation6 + $0x500] sm:$0xff]  ;;  %v2975_v36 = vcombine.high %v172_v30, %v176_v31  ;;  %1737 = vmatprep.subr.bf16.mxu1 %v3095_v29  ;;  %v2974_v42 = vcombine.low %v172_v30, %v176_v31 }
  0x93   :  { %v304_v33 = vld [vmem:[#allocation6 + $0x520] sm:$0xff]  ;;  %1738 = vmatpush1.bf16.msra.mxu1 %v3094_v35 }
  0x94   :  { %v3103_v37 = vcombine.high %v300_v32, %v304_v33  ;;  %v180_v38 = vld [vmem:[#allocation6 + $0x140] sm:$0xff]  ;;  %1698 = vmatprep.subr.bf16.mxu0 %v2975_v36  ;;  %v3102_v43 = vcombine.low %v300_v32, %v304_v33 }
  0x95   :  { %v184_v39 = vld [vmem:[#allocation6 + $0x160] sm:$0xff]  ;;  %1699 = vmatpush1.bf16.msra.mxu0 %v2974_v42 }
  0x96   :  { %v308_v40 = vld [vmem:[#allocation6 + $0x540] sm:$0xff]  ;;  %v2983_v44 = vcombine.high %v180_v38, %v184_v39  ;;  %1739 = vmatprep.subr.bf16.mxu1 %v3103_v37  ;;  %v2982_v50 = vcombine.low %v180_v38, %v184_v39 }
  0x97   :  { %v312_v41 = vld [vmem:[#allocation6 + $0x560] sm:$0xff]  ;;  %1740 = vmatpush1.bf16.msra.mxu1 %v3102_v43 }
  0x98   :  { %v3111_v45 = vcombine.high %v308_v40, %v312_v41  ;;  %v188_v46 = vld [vmem:[#allocation6 + $0x180] sm:$0xff]  ;;  %1700 = vmatprep.subr.bf16.mxu0 %v2983_v44  ;;  %v3110_v51 = vcombine.low %v308_v40, %v312_v41 }
  0x99   :  { %v192_v47 = vld [vmem:[#allocation6 + $0x1a0] sm:$0xff]  ;;  %1701 = vmatpush1.bf16.msra.mxu0 %v2982_v50 }
  0x9a   :  { %v316_v48 = vld [vmem:[#allocation6 + $0x580] sm:$0xff]  ;;  %v2991_v52 = vcombine.high %v188_v46, %v192_v47  ;;  %1741 = vmatprep.subr.bf16.mxu1 %v3111_v45  ;;  %v2990_v62 = vcombine.low %v188_v46, %v192_v47 }
  0x9b   :  { %v320_v49 = vld [vmem:[#allocation6 + $0x5a0] sm:$0xff]  ;;  %1742 = vmatpush1.bf16.msra.mxu1 %v3110_v51 }
  0x9c   :  { %v3119_v55 = vcombine.high %v316_v48, %v320_v49  ;;  %v196_v56 = vld [vmem:[#allocation6 + $0x1c0] sm:$0xff]  ;;  %1702 = vmatprep.subr.bf16.mxu0 %v2991_v52  ;;  %v3118_v63 = vcombine.low %v316_v48, %v320_v49 }
  0x9d   :  { %v200_v57 = vld [vmem:[#allocation6 + $0x1e0] sm:$0xff]  ;;  %1703 = vmatpush1.bf16.msra.mxu0 %v2990_v62 }
  0x9e   :  { %v324_v60 = vld [vmem:[#allocation6 + $0x5c0] sm:$0xff]  ;;  %v2999_v0 = vcombine.high %v196_v56, %v200_v57  ;;  %1743 = vmatprep.subr.bf16.mxu1 %v3119_v55  ;;  %v2998_v6 = vcombine.low %v196_v56, %v200_v57 }
  0x9f   :  { %v328_v61 = vld [vmem:[#allocation6 + $0x5e0] sm:$0xff]  ;;  %1744 = vmatpush1.bf16.msra.mxu1 %v3118_v63 }
  0xa0   :  { %v3127_v1 = vcombine.high %v324_v60, %v328_v61  ;;  %v204_v2 = vld [vmem:[#allocation6 + $0x200] sm:$0xff]  ;;  %1704 = vmatprep.subr.bf16.mxu0 %v2999_v0  ;;  %v3126_v7 = vcombine.low %v324_v60, %v328_v61 }
  0xa1   :  { %v208_v3 = vld [vmem:[#allocation6 + $0x220] sm:$0xff]  ;;  %1705 = vmatpush1.bf16.msra.mxu0 %v2998_v6  ;;  %v141_v6 = vld [vmem:[#allocation6 + $0x8] sm:$0xff] }
  0xa2   :  { %v332_v4 = vld [vmem:[#allocation6 + $0x600] sm:$0xff]  ;;  %v3007_v8 = vcombine.high %v204_v2, %v208_v3  ;;  %1745 = vmatprep.subr.bf16.mxu1 %v3127_v1  ;;  %v3006_v14 = vcombine.low %v204_v2, %v208_v3 }
  0xa3   :  { %v336_v5 = vld [vmem:[#allocation6 + $0x620] sm:$0xff]  ;;  %1746 = vmatpush1.bf16.msra.mxu1 %v3126_v7  ;;  %v145_v7 = vld [vmem:[#allocation6 + $0x28] sm:$0xff] }
  0xa4   :  { %v3135_v9 = vcombine.high %v332_v4, %v336_v5  ;;  %v212_v10 = vld [vmem:[#allocation6 + $0x240] sm:$0xff]  ;;  %1706 = vmatprep.subr.bf16.mxu0 %v3007_v8  ;;  %v3134_v15 = vcombine.low %v332_v4, %v336_v5  ;;  %v269_v8 = vld [vmem:[#allocation6 + $0x408] sm:$0xff] }
  0xa5   :  { %v216_v11 = vld [vmem:[#allocation6 + $0x260] sm:$0xff]  ;;  %1707 = vmatpush1.bf16.msra.mxu0 %v3006_v14  ;;  %v149_v14 = vld [vmem:[#allocation6 + $0x48] sm:$0xff] }
  0xa6   :  { %v340_v12 = vld [vmem:[#allocation6 + $0x640] sm:$0xff]  ;;  %v3015_v16 = vcombine.high %v212_v10, %v216_v11  ;;  %1747 = vmatprep.subr.bf16.mxu1 %v3135_v9  ;;  %v3014_v22 = vcombine.low %v212_v10, %v216_v11  ;;  %v273_v9 = vld [vmem:[#allocation6 + $0x428] sm:$0xff] }
  0xa7   :  { %v344_v13 = vld [vmem:[#allocation6 + $0x660] sm:$0xff]  ;;  %1748 = vmatpush1.bf16.msra.mxu1 %v3134_v15  ;;  %v153_v15 = vld [vmem:[#allocation6 + $0x68] sm:$0xff] }
  0xa8   :  { %v3143_v17 = vcombine.high %v340_v12, %v344_v13  ;;  %v220_v18 = vld [vmem:[#allocation6 + $0x280] sm:$0xff]  ;;  %1708 = vmatprep.subr.bf16.mxu0 %v3015_v16  ;;  %v3142_v23 = vcombine.low %v340_v12, %v344_v13  ;;  %v2945_v12 = vcombine.high %v141_v6, %v145_v7  ;;  %v3073_v13 = vcombine.high %v269_v8, %v273_v9 }
  0xa9   :  { %v224_v19 = vld [vmem:[#allocation6 + $0x2a0] sm:$0xff]  ;;  %1709 = vmatpush1.bf16.msra.mxu0 %v3014_v22  ;;  %v3850_v16 = vcombine.low %v3834_v53, %v3834_v53  ;;  %v2953_v22 = vcombine.high %v149_v14, %v153_v15  ;;  %v2952_v53 = vcombine.low %v149_v14, %v153_v15 }
  0xaa   :  { %v348_v20 = vld [vmem:[#allocation6 + $0x680] sm:$0xff]  ;;  %v3023_v24 = vcombine.high %v220_v18, %v224_v19  ;;  %1749 = vmatprep.subr.bf16.mxu1 %v3143_v17  ;;  %v3022_v30 = vcombine.low %v220_v18, %v224_v19  ;;  %v277_v17 = vld [vmem:[#allocation6 + $0x448] sm:$0xff]  ;;  %v3854_v19 = vcombine.low %v3836_v54, %v3836_v54 }
  0xab   :  { %v352_v21 = vld [vmem:[#allocation6 + $0x6a0] sm:$0xff]  ;;  %1750 = vmatpush1.bf16.msra.mxu1 %v3142_v23  ;;  %v281_v18 = vld [vmem:[#allocation6 + $0x468] sm:$0xff] }
  0xac   :  { %v3151_v25 = vcombine.high %v348_v20, %v352_v21  ;;  %v228_v26 = vld [vmem:[#allocation6 + $0x2c0] sm:$0xff]  ;;  %1710 = vmatprep.subr.bf16.mxu0 %v3023_v24  ;;  %v3150_v31 = vcombine.low %v348_v20, %v352_v21  ;;  %v2944_v20 = vcombine.low %v141_v6, %v145_v7  ;;  %v3072_v21 = vcombine.low %v269_v8, %v273_v9  ;;  %v157_v23 = vld [vmem:[#allocation6 + $0x88] sm:$0xff] }
  0xad   :  { %v232_v27 = vld [vmem:[#allocation6 + $0x2e0] sm:$0xff]  ;;  %1711 = vmatpush1.bf16.msra.mxu0 %v3022_v30  ;;  %v161_v24 = vld [vmem:[#allocation6 + $0xa8] sm:$0xff]  ;;  %v3080_v54 = vcombine.low %v277_v17, %v281_v18 }
  0xae   :  { %v356_v28 = vld [vmem:[#allocation6 + $0x6c0] sm:$0xff]  ;;  %v3031_v32 = vcombine.high %v228_v26, %v232_v27  ;;  %1751 = vmatprep.subr.bf16.mxu1 %v3151_v25  ;;  %v3030_v38 = vcombine.low %v228_v26, %v232_v27  ;;  %v285_v25 = vld [vmem:[#allocation6 + $0x488] sm:$0xff]  ;;  %v3081_v26 = vcombine.high %v277_v17, %v281_v18 }
  0xaf   :  { %v360_v29 = vld [vmem:[#allocation6 + $0x6e0] sm:$0xff]  ;;  %1752 = vmatpush1.bf16.msra.mxu1 %v3150_v31  ;;  %v289_v27 = vld [vmem:[#allocation6 + $0x4a8] sm:$0xff] }
  0xb0   :  { %v3159_v33 = vcombine.high %v356_v28, %v360_v29  ;;  %v236_v34 = vld [vmem:[#allocation6 + $0x300] sm:$0xff]  ;;  %1712 = vmatprep.subr.bf16.mxu0 %v3031_v32  ;;  %v3158_v39 = vcombine.low %v356_v28, %v360_v29  ;;  %v2961_v28 = vcombine.high %v157_v23, %v161_v24  ;;  %v165_v29 = vld [vmem:[#allocation6 + $0xc8] sm:$0xff]  ;;  %v3089_v32 = vcombine.high %v285_v25, %v289_v27 }
  0xb1   :  { %v240_v35 = vld [vmem:[#allocation6 + $0x320] sm:$0xff]  ;;  %1713 = vmatpush1.bf16.msra.mxu0 %v3030_v38  ;;  %v169_v30 = vld [vmem:[#allocation6 + $0xe8] sm:$0xff] }
  0xb2   :  { %v364_v36 = vld [vmem:[#allocation6 + $0x700] sm:$0xff]  ;;  %v3039_v40 = vcombine.high %v236_v34, %v240_v35  ;;  %1753 = vmatprep.subr.bf16.mxu1 %v3159_v33  ;;  %v3038_v46 = vcombine.low %v236_v34, %v240_v35  ;;  %v293_v31 = vld [vmem:[#allocation6 + $0x4c8] sm:$0xff]  ;;  %v2960_v34 = vcombine.low %v157_v23, %v161_v24  ;;  %v3088_v35 = vcombine.low %v285_v25, %v289_v27 }
  0xb3   :  { %v368_v37 = vld [vmem:[#allocation6 + $0x720] sm:$0xff]  ;;  %1754 = vmatpush1.bf16.msra.mxu1 %v3158_v39  ;;  %v297_v33 = vld [vmem:[#allocation6 + $0x4e8] sm:$0xff] }
  0xb4   :  { %v3167_v41 = vcombine.high %v364_v36, %v368_v37  ;;  %v244_v42 = vld [vmem:[#allocation6 + $0x340] sm:$0xff]  ;;  %1714 = vmatprep.subr.bf16.mxu0 %v3039_v40  ;;  %v3166_v47 = vcombine.low %v364_v36, %v368_v37  ;;  %v2969_v36 = vcombine.high %v165_v29, %v169_v30  ;;  %v173_v37 = vld [vmem:[#allocation6 + $0x108] sm:$0xff]  ;;  %v3097_v40 = vcombine.high %v293_v31, %v297_v33 }
  0xb5   :  { %v248_v43 = vld [vmem:[#allocation6 + $0x360] sm:$0xff]  ;;  %1715 = vmatpush1.bf16.msra.mxu0 %v3038_v46  ;;  %v177_v38 = vld [vmem:[#allocation6 + $0x128] sm:$0xff] }
  0xb6   :  { %v372_v44 = vld [vmem:[#allocation6 + $0x740] sm:$0xff]  ;;  %v3047_v48 = vcombine.high %v244_v42, %v248_v43  ;;  %1755 = vmatprep.subr.bf16.mxu1 %v3167_v41  ;;  %v3046_v56 = vcombine.low %v244_v42, %v248_v43  ;;  %v301_v39 = vld [vmem:[#allocation6 + $0x508] sm:$0xff]  ;;  %v2968_v42 = vcombine.low %v165_v29, %v169_v30  ;;  %v3096_v43 = vcombine.low %v293_v31, %v297_v33 }
  0xb7   :  { %v376_v45 = vld [vmem:[#allocation6 + $0x760] sm:$0xff]  ;;  %1756 = vmatpush1.bf16.msra.mxu1 %v3166_v47  ;;  %v305_v41 = vld [vmem:[#allocation6 + $0x528] sm:$0xff] }
  0xb8   :  { %v3175_v49 = vcombine.high %v372_v44, %v376_v45  ;;  %v252_v50 = vld [vmem:[#allocation6 + $0x380] sm:$0xff]  ;;  %1716 = vmatprep.subr.bf16.mxu0 %v3047_v48  ;;  %v3174_v57 = vcombine.low %v372_v44, %v376_v45  ;;  %v2977_v44 = vcombine.high %v173_v37, %v177_v38  ;;  %v181_v45 = vld [vmem:[#allocation6 + $0x148] sm:$0xff]  ;;  %v3105_v48 = vcombine.high %v301_v39, %v305_v41 }
  0xb9   :  { %v256_v51 = vld [vmem:[#allocation6 + $0x3a0] sm:$0xff]  ;;  %1717 = vmatpush1.bf16.msra.mxu0 %v3046_v56  ;;  %v185_v46 = vld [vmem:[#allocation6 + $0x168] sm:$0xff] }
  0xba   :  { %v380_v52 = vld [vmem:[#allocation6 + $0x780] sm:$0xff]  ;;  %v3055_v60 = vcombine.high %v252_v50, %v256_v51  ;;  %1757 = vmatprep.subr.bf16.mxu1 %v3175_v49  ;;  %v3054_v2 = vcombine.low %v252_v50, %v256_v51  ;;  %v309_v47 = vld [vmem:[#allocation6 + $0x548] sm:$0xff]  ;;  %v2976_v50 = vcombine.low %v173_v37, %v177_v38  ;;  %v3104_v51 = vcombine.low %v301_v39, %v305_v41 }
  0xbb   :  { %v384_v55 = vld [vmem:[#allocation6 + $0x7a0] sm:$0xff]  ;;  %1758 = vmatpush1.bf16.msra.mxu1 %v3174_v57  ;;  %v313_v49 = vld [vmem:[#allocation6 + $0x568] sm:$0xff] }
  0xbc   :  { %v3183_v61 = vcombine.high %v380_v52, %v384_v55  ;;  %v260_v62 = vld [vmem:[#allocation6 + $0x3c0] sm:$0xff]  ;;  %1718 = vmatprep.subr.bf16.mxu0 %v3055_v60  ;;  %v3182_v3 = vcombine.low %v380_v52, %v384_v55  ;;  %v2985_v52 = vcombine.high %v181_v45, %v185_v46  ;;  %v189_v55 = vld [vmem:[#allocation6 + $0x188] sm:$0xff]  ;;  %v3113_v60 = vcombine.high %v309_v47, %v313_v49 }
  0xbd   :  { %v264_v63 = vld [vmem:[#allocation6 + $0x3e0] sm:$0xff]  ;;  %1719 = vmatpush1.bf16.msra.mxu0 %v3054_v2  ;;  %v193_v56 = vld [vmem:[#allocation6 + $0x1a8] sm:$0xff] }
  0xbe   :  { %v388_v0 = vld [vmem:[#allocation6 + $0x7c0] sm:$0xff]  ;;  %v3063_v4 = vcombine.high %v260_v62, %v264_v63  ;;  %1759 = vmatprep.subr.bf16.mxu1 %v3183_v61  ;;  %v3062_v10 = vcombine.low %v260_v62, %v264_v63  ;;  %v317_v57 = vld [vmem:[#allocation6 + $0x588] sm:$0xff]  ;;  %v2984_v62 = vcombine.low %v181_v45, %v185_v46  ;;  %v3112_v63 = vcombine.low %v309_v47, %v313_v49 }
  0xbf   :  { %v392_v1 = vld [vmem:[#allocation6 + $0x7e0] sm:$0xff]  ;;  %1760 = vmatpush1.bf16.msra.mxu1 %v3182_v3  ;;  %v321_v61 = vld [vmem:[#allocation6 + $0x5a8] sm:$0xff]  ;;  %v2992_v6 = vcombine.low %v189_v55, %v193_v56 }
  0xc0   :  { %v3191_v5 = vcombine.high %v388_v0, %v392_v1  ;;  %1720 = vmatprep.subr.bf16.mxu0 %v3063_v4  ;;  %v3190_v11 = vcombine.low %v388_v0, %v392_v1  ;;  %v2993_v0 = vcombine.high %v189_v55, %v193_v56  ;;  %v197_v1 = vld [vmem:[#allocation6 + $0x1c8] sm:$0xff]  ;;  %v3121_v4 = vcombine.high %v317_v57, %v321_v61 }
  0xc1   :  { %1721 = vmatpush1.bf16.msra.mxu0 %v3062_v10  ;;  %v201_v2 = vld [vmem:[#allocation6 + $0x1e8] sm:$0xff]  ;;  %v3120_v7 = vcombine.low %v317_v57, %v321_v61 }
  0xc2   :  { %1761 = vmatprep.subr.bf16.mxu1 %v3191_v5  ;;  %1772 = vmatprep.subr.bf16.mxu0 %v2945_v12  ;;  %v325_v3 = vld [vmem:[#allocation6 + $0x5c8] sm:$0xff]  ;;  %v3001_v8 = vcombine.high %v197_v1, %v201_v2  ;;  %v3000_v14 = vcombine.low %v197_v1, %v201_v2 }
  0xc3   :  { %1762 = vmatpush1.bf16.msra.mxu1 %v3190_v11  ;;  %v329_v5 = vld [vmem:[#allocation6 + $0x5e8] sm:$0xff] }
  0xc4   :  { %1813 = vmatprep.subr.bf16.mxu1 %v3073_v13  ;;  %1723 = vmatmul.mubr.bf16.vlgmr.msra.gmra.mrb[0].mxu0 %v3850_v16  ;;  %v205_v9 = vld [vmem:[#allocation6 + $0x208] sm:$0xff]  ;;  %v3129_v12 = vcombine.high %v325_v3, %v329_v5  ;;  %v3128_v15 = vcombine.low %v325_v3, %v329_v5 }
  0xc5   :  { %1773 = vmatpush1.bf16.msra.mxu0 %v2944_v20  ;;  %1804 = vmatprep.mubr.bf16.mxu0 %v3840_v58  ;;  %v209_v10 = vld [vmem:[#allocation6 + $0x228] sm:$0xff] }
  0xc6   :  { %1764 = vmatmul.mubr.bf16.vlgmr.msra.gmra.mrb[0].mxu1 %v3854_v19  ;;  %1774 = vmatprep.subr.bf16.mxu0 %v2953_v22  ;;  %v333_v11 = vld [vmem:[#allocation6 + $0x608] sm:$0xff]  ;;  %v3009_v17 = vcombine.high %v205_v9, %v209_v10  ;;  %v3008_v24 = vcombine.low %v205_v9, %v209_v10 }
  0xc7   :  { %1814 = vmatpush1.bf16.msra.mxu1 %v3072_v21  ;;  %1845 = vmatprep.mubr.bf16.mxu1 %v3844_v59  ;;  %v337_v13 = vld [vmem:[#allocation6 + $0x628] sm:$0xff] }
  0xc8   :  { %1815 = vmatprep.subr.bf16.mxu1 %v3081_v26  ;;  %v213_v18 = vld [vmem:[#allocation6 + $0x248] sm:$0xff]  ;;  %v3137_v22 = vcombine.high %v333_v11, %v337_v13  ;;  %v3136_v25 = vcombine.low %v333_v11, %v337_v13  ;;  %v142_v13 = vld [vmem:[#allocation6 + $0x10] sm:$0xff] }
  0xc9   :  { %1775 = vmatpush1.bf16.msra.mxu0 %v2952_v53  ;;  %v217_v20 = vld [vmem:[#allocation6 + $0x268] sm:$0xff] }
  0xca   :  { %1776 = vmatprep.subr.bf16.mxu0 %v2961_v28  ;;  %v341_v21 = vld [vmem:[#allocation6 + $0x648] sm:$0xff]  ;;  %v3017_v26 = vcombine.high %v213_v18, %v217_v20  ;;  %v3016_v30 = vcombine.low %v213_v18, %v217_v20  ;;  %v274_v18 = vld [vmem:[#allocation6 + $0x430] sm:$0xff] }
  0xcb   :  { %1816 = vmatpush1.bf16.msra.mxu1 %v3080_v54  ;;  %v345_v23 = vld [vmem:[#allocation6 + $0x668] sm:$0xff] }
  0xcc   :  { %1817 = vmatprep.subr.bf16.mxu1 %v3089_v32  ;;  %v221_v27 = vld [vmem:[#allocation6 + $0x288] sm:$0xff]  ;;  %v3145_v28 = vcombine.high %v341_v21, %v345_v23  ;;  %v3144_v31 = vcombine.low %v341_v21, %v345_v23  ;;  %v150_v23 = vld [vmem:[#allocation6 + $0x50] sm:$0xff] }
  0xcd   :  { %1777 = vmatpush1.bf16.msra.mxu0 %v2960_v34  ;;  %v225_v53 = vld [vmem:[#allocation6 + $0x2a8] sm:$0xff] }
  0xce   :  { %1778 = vmatprep.subr.bf16.mxu0 %v2969_v36  ;;  %v349_v54 = vld [vmem:[#allocation6 + $0x688] sm:$0xff]  ;;  %v3025_v32 = vcombine.high %v221_v27, %v225_v53  ;;  %v3024_v38 = vcombine.low %v221_v27, %v225_v53  ;;  %v282_v27 = vld [vmem:[#allocation6 + $0x470] sm:$0xff] }
  0xcf   :  { %1818 = vmatpush1.bf16.msra.mxu1 %v3088_v35  ;;  %v353_v29 = vld [vmem:[#allocation6 + $0x6a8] sm:$0xff] }
  0xd0   :  { %1819 = vmatprep.subr.bf16.mxu1 %v3097_v40  ;;  %v229_v33 = vld [vmem:[#allocation6 + $0x2c8] sm:$0xff]  ;;  %v3153_v36 = vcombine.high %v349_v54, %v353_v29  ;;  %v3152_v39 = vcombine.low %v349_v54, %v353_v29  ;;  %v158_v54 = vld [vmem:[#allocation6 + $0x90] sm:$0xff] }
  0xd1   :  { %1779 = vmatpush1.bf16.msra.mxu0 %v2968_v42  ;;  %v233_v34 = vld [vmem:[#allocation6 + $0x2e8] sm:$0xff] }
  0xd2   :  { %1780 = vmatprep.subr.bf16.mxu0 %v2977_v44  ;;  %v357_v35 = vld [vmem:[#allocation6 + $0x6c8] sm:$0xff]  ;;  %v3033_v40 = vcombine.high %v229_v33, %v233_v34  ;;  %v3032_v46 = vcombine.low %v229_v33, %v233_v34  ;;  %v290_v33 = vld [vmem:[#allocation6 + $0x4b0] sm:$0xff] }
  0xd3   :  { %1820 = vmatpush1.bf16.msra.mxu1 %v3096_v43  ;;  %v361_v37 = vld [vmem:[#allocation6 + $0x6e8] sm:$0xff] }
  0xd4   :  { %1821 = vmatprep.subr.bf16.mxu1 %v3105_v48  ;;  %v237_v41 = vld [vmem:[#allocation6 + $0x308] sm:$0xff]  ;;  %v3161_v44 = vcombine.high %v357_v35, %v361_v37  ;;  %v3160_v47 = vcombine.low %v357_v35, %v361_v37  ;;  %v166_v35 = vld [vmem:[#allocation6 + $0xd0] sm:$0xff] }
  0xd5   :  { %1781 = vmatpush1.bf16.msra.mxu0 %v2976_v50  ;;  %v241_v42 = vld [vmem:[#allocation6 + $0x328] sm:$0xff] }
  0xd6   :  { %1782 = vmatprep.subr.bf16.mxu0 %v2985_v52  ;;  %v365_v43 = vld [vmem:[#allocation6 + $0x708] sm:$0xff]  ;;  %v3041_v48 = vcombine.high %v237_v41, %v241_v42  ;;  %v3040_v56 = vcombine.low %v237_v41, %v241_v42  ;;  %v298_v41 = vld [vmem:[#allocation6 + $0x4f0] sm:$0xff] }
  0xd7   :  { %1822 = vmatpush1.bf16.msra.mxu1 %v3104_v51  ;;  %v369_v45 = vld [vmem:[#allocation6 + $0x728] sm:$0xff] }
  0xd8   :  { %1823 = vmatprep.subr.bf16.mxu1 %v3113_v60  ;;  %v245_v49 = vld [vmem:[#allocation6 + $0x348] sm:$0xff]  ;;  %v3169_v52 = vcombine.high %v365_v43, %v369_v45  ;;  %v3168_v57 = vcombine.low %v365_v43, %v369_v45 }
  0xd9   :  { %1783 = vmatpush1.bf16.msra.mxu0 %v2984_v62  ;;  %v249_v50 = vld [vmem:[#allocation6 + $0x368] sm:$0xff] }
  0xda   :  { %1784 = vmatprep.subr.bf16.mxu0 %v2993_v0  ;;  %v373_v51 = vld [vmem:[#allocation6 + $0x748] sm:$0xff]  ;;  %v3049_v60 = vcombine.high %v245_v49, %v249_v50  ;;  %v3048_v2 = vcombine.low %v245_v49, %v249_v50  ;;  %v306_v49 = vld [vmem:[#allocation6 + $0x530] sm:$0xff] }
  0xdb   :  { %1824 = vmatpush1.bf16.msra.mxu1 %v3112_v63  ;;  %v377_v55 = vld [vmem:[#allocation6 + $0x768] sm:$0xff] }
  0xdc   :  { %1825 = vmatprep.subr.bf16.mxu1 %v3121_v4  ;;  %v253_v61 = vld [vmem:[#allocation6 + $0x388] sm:$0xff]  ;;  %v3177_v0 = vcombine.high %v373_v51, %v377_v55  ;;  %v3176_v3 = vcombine.low %v373_v51, %v377_v55 }
  0xdd   :  { %1785 = vmatpush1.bf16.msra.mxu0 %v2992_v6  ;;  %v257_v62 = vld [vmem:[#allocation6 + $0x3a8] sm:$0xff] }
  0xde   :  { %1786 = vmatprep.subr.bf16.mxu0 %v3001_v8  ;;  %v381_v63 = vld [vmem:[#allocation6 + $0x788] sm:$0xff]  ;;  %v3057_v4 = vcombine.high %v253_v61, %v257_v62  ;;  %v3056_v10 = vcombine.low %v253_v61, %v257_v62  ;;  %v314_v61 = vld [vmem:[#allocation6 + $0x570] sm:$0xff] }
  0xdf   :  { %1826 = vmatpush1.bf16.msra.mxu1 %v3120_v7  ;;  %v385_v1 = vld [vmem:[#allocation6 + $0x7a8] sm:$0xff] }
  0xe0   :  { %1827 = vmatprep.subr.bf16.mxu1 %v3129_v12  ;;  %v261_v5 = vld [vmem:[#allocation6 + $0x3c8] sm:$0xff]  ;;  %v3185_v8 = vcombine.high %v381_v63, %v385_v1  ;;  %v3184_v11 = vcombine.low %v381_v63, %v385_v1 }
  0xe1   :  { %1787 = vmatpush1.bf16.msra.mxu0 %v3000_v14  ;;  %v265_v6 = vld [vmem:[#allocation6 + $0x3e8] sm:$0xff]  ;;  %v146_v14 = vld [vmem:[#allocation6 + $0x30] sm:$0xff] }
  0xe2   :  { %1788 = vmatprep.subr.bf16.mxu0 %v3009_v17  ;;  %v389_v7 = vld [vmem:[#allocation6 + $0x7c8] sm:$0xff]  ;;  %v3065_v12 = vcombine.high %v261_v5, %v265_v6  ;;  %v3064_v20 = vcombine.low %v261_v5, %v265_v6  ;;  %v2946_v53 = vcombine.low %v142_v13, %v146_v14  ;;  %v322_v5 = vld [vmem:[#allocation6 + $0x5b0] sm:$0xff] }
  0xe3   :  { %1828 = vmatpush1.bf16.msra.mxu1 %v3128_v15  ;;  %v393_v9 = vld [vmem:[#allocation6 + $0x7e8] sm:$0xff]  ;;  %v270_v15 = vld [vmem:[#allocation6 + $0x410] sm:$0xff] }
  0xe4   :  { %1829 = vmatprep.subr.bf16.mxu1 %v3137_v22  ;;  %v3193_v17 = vcombine.high %v389_v7, %v393_v9  ;;  %v3192_v21 = vcombine.low %v389_v7, %v393_v9  ;;  %v2947_v22 = vcombine.high %v142_v13, %v146_v14  ;;  %v3074_v29 = vcombine.low %v270_v15, %v274_v18  ;;  %v330_v13 = vld [vmem:[#allocation6 + $0x5f0] sm:$0xff] }
  0xe5   :  { %1789 = vmatpush1.bf16.msra.mxu0 %v3008_v24  ;;  %v154_v24 = vld [vmem:[#allocation6 + $0x70] sm:$0xff] }
  0xe6   :  { %1790 = vmatprep.subr.bf16.mxu0 %v3017_v26  ;;  %v3075_v26 = vcombine.high %v270_v15, %v274_v18  ;;  %v2954_v34 = vcombine.low %v150_v23, %v154_v24 }
  0xe7   :  { %1830 = vmatpush1.bf16.msra.mxu1 %v3136_v25  ;;  %v278_v25 = vld [vmem:[#allocation6 + $0x450] sm:$0xff] }
  0xe8   :  { %1831 = vmatprep.subr.bf16.mxu1 %v3145_v28  ;;  %v162_v28 = vld [vmem:[#allocation6 + $0xb0] sm:$0xff] }
  0xe9   :  { %1791 = vmatpush1.bf16.msra.mxu0 %v3016_v30  ;;  %v2955_v30 = vcombine.high %v150_v23, %v154_v24  ;;  %v2963_v37 = vcombine.high %v158_v54, %v162_v28  ;;  %v2962_v42 = vcombine.low %v158_v54, %v162_v28  ;;  %v338_v23 = vld [vmem:[#allocation6 + $0x630] sm:$0xff] }
  0xea   :  { %1792 = vmatprep.subr.bf16.mxu0 %v3025_v32  ;;  %v286_v32 = vld [vmem:[#allocation6 + $0x490] sm:$0xff] }
  0xeb   :  { %1832 = vmatpush1.bf16.msra.mxu1 %v3144_v31  ;;  %v3083_v31 = vcombine.high %v278_v25, %v282_v27  ;;  %v3090_v43 = vcombine.low %v286_v32, %v290_v33  ;;  %v218_v54 = vld [vmem:[#allocation6 + $0x270] sm:$0xff] }
  0xec   :  { %1833 = vmatprep.subr.bf16.mxu1 %v3153_v36  ;;  %v3082_v36 = vcombine.low %v278_v25, %v282_v27  ;;  %v342_v28 = vld [vmem:[#allocation6 + $0x650] sm:$0xff] }
  0xed   :  { %1793 = vmatpush1.bf16.msra.mxu0 %v3024_v38  ;;  %v170_v38 = vld [vmem:[#allocation6 + $0xf0] sm:$0xff] }
  0xee   :  { %1794 = vmatprep.subr.bf16.mxu0 %v3033_v40  ;;  %v294_v40 = vld [vmem:[#allocation6 + $0x4d0] sm:$0xff]  ;;  %v2970_v50 = vcombine.low %v166_v35, %v170_v38 }
  0xef   :  { %1834 = vmatpush1.bf16.msra.mxu1 %v3152_v39  ;;  %v3091_v39 = vcombine.high %v286_v32, %v290_v33  ;;  %v3099_v45 = vcombine.high %v294_v40, %v298_v41  ;;  %v3098_v51 = vcombine.low %v294_v40, %v298_v41 }
  0xf0   :  { %1835 = vmatprep.subr.bf16.mxu1 %v3161_v44  ;;  %v2971_v44 = vcombine.high %v166_v35, %v170_v38  ;;  %v226_v35 = vld [vmem:[#allocation6 + $0x2b0] sm:$0xff] }
  0xf1   :  { %1795 = vmatpush1.bf16.msra.mxu0 %v3032_v46  ;;  %v174_v46 = vld [vmem:[#allocation6 + $0x110] sm:$0xff] }
  0xf2   :  { %1796 = vmatprep.subr.bf16.mxu0 %v3041_v48  ;;  %v302_v48 = vld [vmem:[#allocation6 + $0x510] sm:$0xff] }
  0xf3   :  { %1836 = vmatpush1.bf16.msra.mxu1 %v3160_v47  ;;  %v178_v47 = vld [vmem:[#allocation6 + $0x130] sm:$0xff]  ;;  %v3107_v55 = vcombine.high %v302_v48, %v306_v49  ;;  %v3106_v63 = vcombine.low %v302_v48, %v306_v49 }
  0xf4   :  { %1837 = vmatprep.subr.bf16.mxu1 %v3169_v52  ;;  %v2979_v52 = vcombine.high %v174_v46, %v178_v47  ;;  %v2978_v62 = vcombine.low %v174_v46, %v178_v47 }
  0xf5   :  { %1797 = vmatpush1.bf16.msra.mxu0 %v3040_v56  ;;  %v182_v56 = vld [vmem:[#allocation6 + $0x150] sm:$0xff] }
  0xf6   :  { %1798 = vmatprep.subr.bf16.mxu0 %v3049_v60  ;;  %v310_v60 = vld [vmem:[#allocation6 + $0x550] sm:$0xff] }
  0xf7   :  { %1838 = vmatpush1.bf16.msra.mxu1 %v3168_v57  ;;  %v186_v57 = vld [vmem:[#allocation6 + $0x170] sm:$0xff]  ;;  %v3115_v1 = vcombine.high %v310_v60, %v314_v61  ;;  %v3114_v7 = vcombine.low %v310_v60, %v314_v61 }
  0xf8   :  { %1839 = vmatprep.subr.bf16.mxu1 %v3177_v0  ;;  %v2987_v0 = vcombine.high %v182_v56, %v186_v57  ;;  %v2986_v6 = vcombine.low %v182_v56, %v186_v57 }
  0xf9   :  { %1799 = vmatpush1.bf16.msra.mxu0 %v3048_v2  ;;  %v190_v2 = vld [vmem:[#allocation6 + $0x190] sm:$0xff] }
  0xfa   :  { %1800 = vmatprep.subr.bf16.mxu0 %v3057_v4  ;;  %v318_v4 = vld [vmem:[#allocation6 + $0x590] sm:$0xff] }
  0xfb   :  { %1840 = vmatpush1.bf16.msra.mxu1 %v3176_v3  ;;  %v194_v3 = vld [vmem:[#allocation6 + $0x1b0] sm:$0xff]  ;;  %v3123_v9 = vcombine.high %v318_v4, %v322_v5  ;;  %v3122_v15 = vcombine.low %v318_v4, %v322_v5 }
  0xfc   :  { %1841 = vmatprep.subr.bf16.mxu1 %v3185_v8  ;;  %v2995_v8 = vcombine.high %v190_v2, %v194_v3  ;;  %v2994_v14 = vcombine.low %v190_v2, %v194_v3 }
  0xfd   :  { %1801 = vmatpush1.bf16.msra.mxu0 %v3056_v10  ;;  %v198_v10 = vld [vmem:[#allocation6 + $0x1d0] sm:$0xff] }
  0xfe   :  { %1802 = vmatprep.subr.bf16.mxu0 %v3065_v12  ;;  %v326_v12 = vld [vmem:[#allocation6 + $0x5d0] sm:$0xff] }
  0xff   :  { %1842 = vmatpush1.bf16.msra.mxu1 %v3184_v11  ;;  %v202_v11 = vld [vmem:[#allocation6 + $0x1f0] sm:$0xff]  ;;  %v3131_v18 = vcombine.high %v326_v12, %v330_v13  ;;  %v3130_v25 = vcombine.low %v326_v12, %v330_v13 }
 0x100   :  { %1843 = vmatprep.subr.bf16.mxu1 %v3193_v17  ;;  %v3003_v17 = vcombine.high %v198_v10, %v202_v11  ;;  %v3002_v24 = vcombine.low %v198_v10, %v202_v11 }
 0x101   :  { %1803 = vmatpush1.bf16.msra.mxu0 %v3064_v20  ;;  %v206_v20 = vld [vmem:[#allocation6 + $0x210] sm:$0xff] }
 0x102   :  { %1854 = vmatprep.subr.bf16.mxu0 %v2947_v22  ;;  %v334_v22 = vld [vmem:[#allocation6 + $0x610] sm:$0xff] }
 0x103   :  { %1844 = vmatpush1.bf16.msra.mxu1 %v3192_v21  ;;  %v210_v21 = vld [vmem:[#allocation6 + $0x230] sm:$0xff]  ;;  %v3139_v27 = vcombine.high %v334_v22, %v338_v23 }
 0x104   :  { %1895 = vmatprep.subr.bf16.mxu1 %v3075_v26  ;;  %1805 = vmatmul.mubr.bf16.vlgmr.msra.gmra.mrb[4].mxu0 %v3850_v16  ;;  %v3011_v26 = vcombine.high %v206_v20, %v210_v21 }
 0x105   :  { %1855 = vmatpush1.bf16.msra.mxu0 %v2946_v53  ;;  %1886 = vmatprep.mubr.bf16.mxu0 %v3840_v58  ;;  %v214_v53 = vld [vmem:[#allocation6 + $0x250] sm:$0xff] }
 0x106   :  { %1846 = vmatmul.mubr.bf16.vlgmr.msra.gmra.mrb[4].mxu1 %v3854_v19  ;;  %1856 = vmatprep.subr.bf16.mxu0 %v2955_v30  ;;  %v3010_v30 = vcombine.low %v206_v20, %v210_v21  ;;  %v3019_v32 = vcombine.high %v214_v53, %v218_v54  ;;  %v3018_v38 = vcombine.low %v214_v53, %v218_v54 }
 0x107   :  { %1896 = vmatpush1.bf16.msra.mxu1 %v3074_v29  ;;  %1927 = vmatprep.mubr.bf16.mxu1 %v3844_v59  ;;  %v346_v29 = vld [vmem:[#allocation6 + $0x670] sm:$0xff] }
 0x108   :  { %1897 = vmatprep.subr.bf16.mxu1 %v3083_v31  ;;  %v3138_v31 = vcombine.low %v334_v22, %v338_v23  ;;  %v3147_v33 = vcombine.high %v342_v28, %v346_v29 }
 0x109   :  { %1857 = vmatpush1.bf16.msra.mxu0 %v2954_v34  ;;  %v222_v34 = vld [vmem:[#allocation6 + $0x290] sm:$0xff] }
 0x10a   :  { %1858 = vmatprep.subr.bf16.mxu0 %v2963_v37  ;;  %v354_v37 = vld [vmem:[#allocation6 + $0x6b0] sm:$0xff]  ;;  %v3027_v40 = vcombine.high %v222_v34, %v226_v35  ;;  %v3026_v46 = vcombine.low %v222_v34, %v226_v35 }
 0x10b   :  { %1898 = vmatpush1.bf16.msra.mxu1 %v3082_v36  ;;  %v350_v36 = vld [vmem:[#allocation6 + $0x690] sm:$0xff] }
 0x10c   :  { %1899 = vmatprep.subr.bf16.mxu1 %v3091_v39  ;;  %v3146_v39 = vcombine.low %v342_v28, %v346_v29  ;;  %v3155_v41 = vcombine.high %v350_v36, %v354_v37  ;;  %v3154_v47 = vcombine.low %v350_v36, %v354_v37 }
 0x10d   :  { %1859 = vmatpush1.bf16.msra.mxu0 %v2962_v42  ;;  %v230_v42 = vld [vmem:[#allocation6 + $0x2d0] sm:$0xff] }
 0x10e   :  { %1860 = vmatprep.subr.bf16.mxu0 %v2971_v44  ;;  %v358_v44 = vld [vmem:[#allocation6 + $0x6d0] sm:$0xff] }
 0x10f   :  { %1900 = vmatpush1.bf16.msra.mxu1 %v3090_v43  ;;  %v234_v43 = vld [vmem:[#allocation6 + $0x2f0] sm:$0xff] }
 0x110   :  { %1901 = vmatprep.subr.bf16.mxu1 %v3099_v45  ;;  %v362_v45 = vld [vmem:[#allocation6 + $0x6f0] sm:$0xff]  ;;  %v3035_v48 = vcombine.high %v230_v42, %v234_v43  ;;  %v3034_v56 = vcombine.low %v230_v42, %v234_v43 }
 0x111   :  { %1861 = vmatpush1.bf16.msra.mxu0 %v2970_v50  ;;  %v3163_v49 = vcombine.high %v358_v44, %v362_v45  ;;  %v238_v50 = vld [vmem:[#allocation6 + $0x310] sm:$0xff]  ;;  %v3162_v57 = vcombine.low %v358_v44, %v362_v45 }
 0x112   :  { %1862 = vmatprep.subr.bf16.mxu0 %v2979_v52  ;;  %v366_v52 = vld [vmem:[#allocation6 + $0x710] sm:$0xff] }
 0x113   :  { %1902 = vmatpush1.bf16.msra.mxu1 %v3098_v51  ;;  %v242_v51 = vld [vmem:[#allocation6 + $0x330] sm:$0xff] }
 0x114   :  { %1903 = vmatprep.subr.bf16.mxu1 %v3107_v55  ;;  %v370_v55 = vld [vmem:[#allocation6 + $0x730] sm:$0xff]  ;;  %v3043_v60 = vcombine.high %v238_v50, %v242_v51  ;;  %v3042_v2 = vcombine.low %v238_v50, %v242_v51 }
 0x115   :  { %1863 = vmatpush1.bf16.msra.mxu0 %v2978_v62  ;;  %v3171_v61 = vcombine.high %v366_v52, %v370_v55  ;;  %v246_v62 = vld [vmem:[#allocation6 + $0x350] sm:$0xff]  ;;  %v3170_v3 = vcombine.low %v366_v52, %v370_v55 }
 0x116   :  { %1864 = vmatprep.subr.bf16.mxu0 %v2987_v0  ;;  %v374_v0 = vld [vmem:[#allocation6 + $0x750] sm:$0xff] }
 0x117   :  { %1904 = vmatpush1.bf16.msra.mxu1 %v3106_v63  ;;  %v250_v63 = vld [vmem:[#allocation6 + $0x370] sm:$0xff] }
 0x118   :  { %1905 = vmatprep.subr.bf16.mxu1 %v3115_v1  ;;  %v378_v1 = vld [vmem:[#allocation6 + $0x770] sm:$0xff]  ;;  %v3051_v4 = vcombine.high %v246_v62, %v250_v63  ;;  %v3050_v10 = vcombine.low %v246_v62, %v250_v63 }
 0x119   :  { %1865 = vmatpush1.bf16.msra.mxu0 %v2986_v6  ;;  %v3179_v5 = vcombine.high %v374_v0, %v378_v1  ;;  %v254_v6 = vld [vmem:[#allocation6 + $0x390] sm:$0xff]  ;;  %v3178_v11 = vcombine.low %v374_v0, %v378_v1  ;;  %v183_v0 = vld [vmem:[#allocation6 + $0x158] sm:$0xff] }
 0x11a   :  { %1866 = vmatprep.subr.bf16.mxu0 %v2995_v8  ;;  %v382_v8 = vld [vmem:[#allocation6 + $0x790] sm:$0xff]  ;;  %v187_v1 = vld [vmem:[#allocation6 + $0x178] sm:$0xff] }
 0x11b   :  { %1906 = vmatpush1.bf16.msra.mxu1 %v3114_v7  ;;  %v258_v7 = vld [vmem:[#allocation6 + $0x3b0] sm:$0xff] }
 0x11c   :  { %1907 = vmatprep.subr.bf16.mxu1 %v3123_v9  ;;  %v386_v9 = vld [vmem:[#allocation6 + $0x7b0] sm:$0xff]  ;;  %v3059_v12 = vcombine.high %v254_v6, %v258_v7  ;;  %v3058_v20 = vcombine.low %v254_v6, %v258_v7  ;;  %v2989_v6 = vcombine.high %v183_v0, %v187_v1 }
 0x11d   :  { %1867 = vmatpush1.bf16.msra.mxu0 %v2994_v14  ;;  %v3187_v13 = vcombine.high %v382_v8, %v386_v9  ;;  %v262_v14 = vld [vmem:[#allocation6 + $0x3d0] sm:$0xff]  ;;  %v3186_v21 = vcombine.low %v382_v8, %v386_v9  ;;  %v191_v8 = vld [vmem:[#allocation6 + $0x198] sm:$0xff] }
 0x11e   :  { %1868 = vmatprep.subr.bf16.mxu0 %v3003_v17  ;;  %v390_v17 = vld [vmem:[#allocation6 + $0x7d0] sm:$0xff]  ;;  %v195_v9 = vld [vmem:[#allocation6 + $0x1b8] sm:$0xff] }
 0x11f   :  { %1908 = vmatpush1.bf16.msra.mxu1 %v3122_v15  ;;  %v266_v15 = vld [vmem:[#allocation6 + $0x3f0] sm:$0xff] }
 0x120   :  { %1909 = vmatprep.subr.bf16.mxu1 %v3131_v18  ;;  %v394_v18 = vld [vmem:[#allocation6 + $0x7f0] sm:$0xff]  ;;  %v3067_v22 = vcombine.high %v262_v14, %v266_v15  ;;  %v3066_v53 = vcombine.low %v262_v14, %v266_v15  ;;  %v2997_v14 = vcombine.high %v191_v8, %v195_v9 }
 0x121   :  { %1869 = vmatpush1.bf16.msra.mxu0 %v3002_v24  ;;  %v3195_v23 = vcombine.high %v390_v17, %v394_v18  ;;  %v143_v24 = vld [vmem:[#allocation6 + $0x18] sm:$0xff]  ;;  %v3194_v54 = vcombine.low %v390_v17, %v394_v18 }
 0x122   :  { %1870 = vmatprep.subr.bf16.mxu0 %v3011_v26  ;;  %v271_v26 = vld [vmem:[#allocation6 + $0x418] sm:$0xff] }
 0x123   :  { %1910 = vmatpush1.bf16.msra.mxu1 %v3130_v25  ;;  %v147_v25 = vld [vmem:[#allocation6 + $0x38] sm:$0xff] }
 0x124   :  { %1911 = vmatprep.subr.bf16.mxu1 %v3139_v27  ;;  %v275_v27 = vld [vmem:[#allocation6 + $0x438] sm:$0xff]  ;;  %v2949_v28 = vcombine.high %v143_v24, %v147_v25  ;;  %v2948_v34 = vcombine.low %v143_v24, %v147_v25 }
 0x125   :  { %1871 = vmatpush1.bf16.msra.mxu0 %v3010_v30  ;;  %v3077_v29 = vcombine.high %v271_v26, %v275_v27  ;;  %v151_v30 = vld [vmem:[#allocation6 + $0x58] sm:$0xff]  ;;  %v3076_v35 = vcombine.low %v271_v26, %v275_v27 }
 0x126   :  { %1872 = vmatprep.subr.bf16.mxu0 %v3019_v32  ;;  %v279_v32 = vld [vmem:[#allocation6 + $0x458] sm:$0xff] }
 0x127   :  { %1912 = vmatpush1.bf16.msra.mxu1 %v3138_v31  ;;  %v155_v31 = vld [vmem:[#allocation6 + $0x78] sm:$0xff] }
 0x128   :  { %1913 = vmatprep.subr.bf16.mxu1 %v3147_v33  ;;  %v283_v33 = vld [vmem:[#allocation6 + $0x478] sm:$0xff]  ;;  %v2957_v36 = vcombine.high %v151_v30, %v155_v31  ;;  %v2956_v42 = vcombine.low %v151_v30, %v155_v31 }
 0x129   :  { %1873 = vmatpush1.bf16.msra.mxu0 %v3018_v38  ;;  %v3085_v37 = vcombine.high %v279_v32, %v283_v33  ;;  %v159_v38 = vld [vmem:[#allocation6 + $0x98] sm:$0xff]  ;;  %v3084_v43 = vcombine.low %v279_v32, %v283_v33 }
 0x12a   :  { %1874 = vmatprep.subr.bf16.mxu0 %v3027_v40  ;;  %v287_v40 = vld [vmem:[#allocation6 + $0x498] sm:$0xff] }
 0x12b   :  { %1914 = vmatpush1.bf16.msra.mxu1 %v3146_v39  ;;  %v163_v39 = vld [vmem:[#allocation6 + $0xb8] sm:$0xff] }
 0x12c   :  { %1915 = vmatprep.subr.bf16.mxu1 %v3155_v41  ;;  %v291_v41 = vld [vmem:[#allocation6 + $0x4b8] sm:$0xff]  ;;  %v2965_v44 = vcombine.high %v159_v38, %v163_v39  ;;  %v2964_v50 = vcombine.low %v159_v38, %v163_v39 }
 0x12d   :  { %1875 = vmatpush1.bf16.msra.mxu0 %v3026_v46  ;;  %v3093_v45 = vcombine.high %v287_v40, %v291_v41  ;;  %v167_v46 = vld [vmem:[#allocation6 + $0xd8] sm:$0xff]  ;;  %v3092_v51 = vcombine.low %v287_v40, %v291_v41 }
 0x12e   :  { %1876 = vmatprep.subr.bf16.mxu0 %v3035_v48  ;;  %v295_v48 = vld [vmem:[#allocation6 + $0x4d8] sm:$0xff] }
 0x12f   :  { %1916 = vmatpush1.bf16.msra.mxu1 %v3154_v47  ;;  %v171_v47 = vld [vmem:[#allocation6 + $0xf8] sm:$0xff] }
 0x130   :  { %1917 = vmatprep.subr.bf16.mxu1 %v3163_v49  ;;  %v299_v49 = vld [vmem:[#allocation6 + $0x4f8] sm:$0xff]  ;;  %v2973_v52 = vcombine.high %v167_v46, %v171_v47  ;;  %v2972_v62 = vcombine.low %v167_v46, %v171_v47 }
 0x131   :  { %1877 = vmatpush1.bf16.msra.mxu0 %v3034_v56  ;;  %v3101_v55 = vcombine.high %v295_v48, %v299_v49  ;;  %v175_v56 = vld [vmem:[#allocation6 + $0x118] sm:$0xff] }
 0x132   :  { %1878 = vmatprep.subr.bf16.mxu0 %v3043_v60  ;;  %v303_v60 = vld [vmem:[#allocation6 + $0x518] sm:$0xff] }
 0x133   :  { %1918 = vmatpush1.bf16.msra.mxu1 %v3162_v57  ;;  %v179_v57 = vld [vmem:[#allocation6 + $0x138] sm:$0xff] }
 0x134   :  { %1919 = vmatprep.subr.bf16.mxu1 %v3171_v61  ;;  %v307_v61 = vld [vmem:[#allocation6 + $0x538] sm:$0xff]  ;;  %v2981_v63 = vcombine.high %v175_v56, %v179_v57 }
 0x135   :  { %1879 = vmatpush1.bf16.msra.mxu0 %v3042_v2  ;;  %v311_v2 = vld [vmem:[#allocation6 + $0x558] sm:$0xff] }
 0x136   :  { %1880 = vmatprep.subr.bf16.mxu0 %v3051_v4  ;;  %v2980_v4 = vcombine.low %v175_v56, %v179_v57  ;;  %v199_v17 = vld [vmem:[#allocation6 + $0x1d8] sm:$0xff] }
 0x137   :  { %1920 = vmatpush1.bf16.msra.mxu1 %v3170_v3  ;;  %v315_v3 = vld [vmem:[#allocation6 + $0x578] sm:$0xff] }
 0x138   :  { %1921 = vmatprep.subr.bf16.mxu1 %v3179_v5  ;;  %v3108_v5 = vcombine.low %v303_v60, %v307_v61  ;;  %v3117_v7 = vcombine.high %v311_v2, %v315_v3  ;;  %v203_v18 = vld [vmem:[#allocation6 + $0x1f8] sm:$0xff] }
 0x139   :  { %1881 = vmatpush1.bf16.msra.mxu0 %v3050_v10  ;;  %v319_v10 = vld [vmem:[#allocation6 + $0x598] sm:$0xff]  ;;  %v3005_v24 = vcombine.high %v199_v17, %v203_v18 }
 0x13a   :  { %1882 = vmatprep.subr.bf16.mxu0 %v3059_v12  ;;  %v2988_v12 = vcombine.low %v183_v0, %v187_v1  ;;  %v207_v26 = vld [vmem:[#allocation6 + $0x218] sm:$0xff] }
 0x13b   :  { %1922 = vmatpush1.bf16.msra.mxu1 %v3178_v11  ;;  %v323_v11 = vld [vmem:[#allocation6 + $0x5b8] sm:$0xff] }
 0x13c   :  { %1923 = vmatprep.subr.bf16.mxu1 %v3187_v13  ;;  %v3116_v13 = vcombine.low %v311_v2, %v315_v3  ;;  %v3125_v15 = vcombine.high %v319_v10, %v323_v11  ;;  %v211_v27 = vld [vmem:[#allocation6 + $0x238] sm:$0xff] }
 0x13d   :  { %1883 = vmatpush1.bf16.msra.mxu0 %v3058_v20  ;;  %v327_v20 = vld [vmem:[#allocation6 + $0x5d8] sm:$0xff]  ;;  %v3013_v30 = vcombine.high %v207_v26, %v211_v27 }
 0x13e   :  { %1884 = vmatprep.subr.bf16.mxu0 %v3067_v22  ;;  %v2996_v22 = vcombine.low %v191_v8, %v195_v9  ;;  %v215_v32 = vld [vmem:[#allocation6 + $0x258] sm:$0xff] }
 0x13f   :  { %1924 = vmatpush1.bf16.msra.mxu1 %v3186_v21  ;;  %v331_v21 = vld [vmem:[#allocation6 + $0x5f8] sm:$0xff] }
 0x140   :  { %1925 = vmatprep.subr.bf16.mxu1 %v3195_v23  ;;  %v3124_v23 = vcombine.low %v319_v10, %v323_v11  ;;  %v3133_v25 = vcombine.high %v327_v20, %v331_v21  ;;  %v219_v33 = vld [vmem:[#allocation6 + $0x278] sm:$0xff] }
 0x141   :  { %1885 = vmatpush1.bf16.msra.mxu0 %v3066_v53  ;;  %v335_v53 = vld [vmem:[#allocation6 + $0x618] sm:$0xff]  ;;  %v3021_v38 = vcombine.high %v215_v32, %v219_v33 }
 0x142   :  { %1936 = vmatprep.subr.bf16.mxu0 %v2949_v28  ;;  %v3004_v28 = vcombine.low %v199_v17, %v203_v18  ;;  %v223_v40 = vld [vmem:[#allocation6 + $0x298] sm:$0xff] }
 0x143   :  { %1926 = vmatpush1.bf16.msra.mxu1 %v3194_v54  ;;  %v339_v54 = vld [vmem:[#allocation6 + $0x638] sm:$0xff] }
 0x144   :  { %1977 = vmatprep.subr.bf16.mxu1 %v3077_v29  ;;  %1887 = vmatmul.mubr.bf16.vlgmr.msra.gmra.mrb[8].mxu0 %v3850_v16  ;;  %v3132_v29 = vcombine.low %v327_v20, %v331_v21  ;;  %v3141_v31 = vcombine.high %v335_v53, %v339_v54  ;;  %v227_v41 = vld [vmem:[#allocation6 + $0x2b8] sm:$0xff] }
 0x145   :  { %1937 = vmatpush1.bf16.msra.mxu0 %v2948_v34  ;;  %1968 = vmatprep.mubr.bf16.mxu0 %v3840_v58  ;;  %v3100_v58 = vcombine.low %v295_v48, %v299_v49  ;;  %v343_v34 = vld [vmem:[#allocation6 + $0x658] sm:$0xff]  ;;  %v3029_v46 = vcombine.high %v223_v40, %v227_v41 }
 0x146   :  { %1928 = vmatmul.mubr.bf16.vlgmr.msra.gmra.mrb[8].mxu1 %v3854_v19  ;;  %1938 = vmatprep.subr.bf16.mxu0 %v2957_v36  ;;  %v3012_v36 = vcombine.low %v207_v26, %v211_v27  ;;  %v231_v48 = vld [vmem:[#allocation6 + $0x2d8] sm:$0xff] }
 0x147   :  { %1978 = vmatpush1.bf16.msra.mxu1 %v3076_v35  ;;  %2009 = vmatprep.mubr.bf16.mxu1 %v3844_v59  ;;  %v3109_v59 = vcombine.high %v303_v60, %v307_v61  ;;  %v347_v35 = vld [vmem:[#allocation6 + $0x678] sm:$0xff] }
 0x148   :  { %1979 = vmatprep.subr.bf16.mxu1 %v3085_v37  ;;  %v3140_v37 = vcombine.low %v335_v53, %v339_v54  ;;  %v3149_v39 = vcombine.high %v343_v34, %v347_v35  ;;  %v235_v49 = vld [vmem:[#allocation6 + $0x2f8] sm:$0xff] }
 0x149   :  { %1939 = vmatpush1.bf16.msra.mxu0 %v2956_v42  ;;  %v351_v42 = vld [vmem:[#allocation6 + $0x698] sm:$0xff]  ;;  %v3037_v56 = vcombine.high %v231_v48, %v235_v49 }
 0x14a   :  { %1940 = vmatprep.subr.bf16.mxu0 %v2965_v44  ;;  %v3020_v44 = vcombine.low %v215_v32, %v219_v33  ;;  %v239_v60 = vld [vmem:[#allocation6 + $0x318] sm:$0xff]  ;;  %v3425_v32 = vld [vmem:[#allocation9 + $0x80] sm:$0xff]   ;;  %v3426_v33 = vld [vmem:[#allocation9 + $0xc8] sm:$0xff]  }
 0x14b   :  { %1980 = vmatpush1.bf16.msra.mxu1 %v3084_v43  ;;  %v355_v43 = vld [vmem:[#allocation6 + $0x6b8] sm:$0xff] }
 0x14c   :  { %1981 = vmatprep.subr.bf16.mxu1 %v3093_v45  ;;  %v3148_v45 = vcombine.low %v343_v34, %v347_v35  ;;  %v3157_v47 = vcombine.high %v351_v42, %v355_v43  ;;  %v243_v61 = vld [vmem:[#allocation6 + $0x338] sm:$0xff]  ;;  %v3411_v34 = vld [vmem:[#allocation9 + $0x8] sm:$0xff]  }
 0x14d   :  { %1941 = vmatpush1.bf16.msra.mxu0 %v2964_v50  ;;  %v359_v50 = vld [vmem:[#allocation6 + $0x6d8] sm:$0xff]  ;;  %v3045_v0 = vcombine.high %v239_v60, %v243_v61 }
 0x14e   :  { %1942 = vmatprep.subr.bf16.mxu0 %v2973_v52  ;;  %v3028_v52 = vcombine.low %v223_v40, %v227_v41  ;;  %v247_v2 = vld [vmem:[#allocation6 + $0x358] sm:$0xff]  ;;  %v2047_v41 = vlaneseq }
 0x14f   :  { %1982 = vmatpush1.bf16.msra.mxu1 %v3092_v51  ;;  %v363_v51 = vld [vmem:[#allocation6 + $0x6f8] sm:$0xff] }
 0x150   :  { %1983 = vmatprep.subr.bf16.mxu1 %v3101_v55  ;;  %v3156_v55 = vcombine.low %v351_v42, %v355_v43  ;;  %v3165_v57 = vcombine.high %v359_v50, %v363_v51  ;;  %v251_v3 = vld [vmem:[#allocation6 + $0x378] sm:$0xff]  ;;  %v3430_v42 = vld [vmem:[#allocation9 + $0xd8] sm:$0xff]  }
 0x151   :  { %1943 = vmatpush1.bf16.msra.mxu0 %v2972_v62  ;;  %v367_v62 = vld [vmem:[#allocation6 + $0x718] sm:$0xff]  ;;  %v3053_v8 = vcombine.high %v247_v2, %v251_v3  ;;  %v3431_v43 = vld [vmem:[#allocation9 + $0x98] sm:$0xff]  }
 0x152   :  { %1944 = vmatprep.subr.bf16.mxu0 %v2981_v63  ;;  %v3036_v63 = vcombine.low %v231_v48, %v235_v49  ;;  %v255_v10 = vld [vmem:[#allocation6 + $0x398] sm:$0xff]  ;;  %v3433_v48 = vld [vmem:[#allocation9 + $0xa0] sm:$0xff]  }
 0x153   :  { %1984 = vmatpush1.bf16.msra.mxu1 %v3100_v58  ;;  %v371_v58 = vld [vmem:[#allocation6 + $0x738] sm:$0xff] }
 0x154   :  { %1985 = vmatprep.subr.bf16.mxu1 %v3109_v59  ;;  %v3164_v59 = vcombine.low %v359_v50, %v363_v51  ;;  %v3173_v1 = vcombine.high %v367_v62, %v371_v58  ;;  %v259_v11 = vld [vmem:[#allocation6 + $0x3b8] sm:$0xff]  ;;  %v3434_v50 = vld [vmem:[#allocation9 + $0xe8] sm:$0xff]   ;;  %v3873_v51 = vld [vmem:[#allocation8] sm:$0xff] }
 0x155   :  { %1945 = vmatpush1.bf16.msra.mxu0 %v2980_v4  ;;  %v375_v4 = vld [vmem:[#allocation6 + $0x758] sm:$0xff]  ;;  %v3061_v17 = vcombine.high %v255_v10, %v259_v11 }
 0x156   :  { %1946 = vmatprep.subr.bf16.mxu0 %v2989_v6  ;;  %v3044_v6 = vcombine.low %v239_v60, %v243_v61  ;;  %v263_v20 = vld [vmem:[#allocation6 + $0x3d8] sm:$0xff] }
 0x157   :  { %1986 = vmatpush1.bf16.msra.mxu1 %v3108_v5  ;;  %v379_v5 = vld [vmem:[#allocation6 + $0x778] sm:$0xff] }
 0x158   :  { %1987 = vmatprep.subr.bf16.mxu1 %v3117_v7  ;;  %v3172_v7 = vcombine.low %v367_v62, %v371_v58  ;;  %v3181_v9 = vcombine.high %v375_v4, %v379_v5  ;;  %v267_v21 = vld [vmem:[#allocation6 + $0x3f8] sm:$0xff] }
 0x159   :  { %1947 = vmatpush1.bf16.msra.mxu0 %v2988_v12  ;;  %v383_v12 = vld [vmem:[#allocation6 + $0x798] sm:$0xff]  ;;  %v3069_v26 = vcombine.high %v263_v20, %v267_v21  ;;  %v3068_v53 = vcombine.low %v263_v20, %v267_v21  ;;  %v3441_v21 = vld [vmem:[#allocation9 + $0x100] sm:$0xff]  }
 0x15a   :  { %1948 = vmatprep.subr.bf16.mxu0 %v2997_v14  ;;  %v3052_v14 = vcombine.low %v247_v2, %v251_v3  ;;  %v3412_v35 = vld [vmem:[#allocation9 + $0x50] sm:$0xff]  }
 0x15b   :  { %1988 = vmatpush1.bf16.msra.mxu1 %v3116_v13  ;;  %v387_v13 = vld [vmem:[#allocation6 + $0x7b8] sm:$0xff] }
 0x15c   :  { %1989 = vmatprep.subr.bf16.mxu1 %v3125_v15  ;;  %v3180_v15 = vcombine.low %v375_v4, %v379_v5  ;;  %v3189_v18 = vcombine.high %v383_v12, %v387_v13  ;;  %v3429_v40 = vld [vmem:[#allocation9 + $0x90] sm:$0xff]  }
 0x15d   :  { %1949 = vmatpush1.bf16.msra.mxu0 %v2996_v22  ;;  %v391_v22 = vld [vmem:[#allocation6 + $0x7d8] sm:$0xff] }
 0x15e   :  { %1950 = vmatprep.subr.bf16.mxu0 %v3005_v24  ;;  %v3060_v24 = vcombine.low %v255_v10, %v259_v11  ;;  %v3436_v62 = vld [vmem:[#allocation9 + $0xf0] sm:$0xff]   ;;  %v3438_v11 = vld [vmem:[#allocation9 + $0xf8] sm:$0xff]  }
 0x15f   :  { %1990 = vmatpush1.bf16.msra.mxu1 %v3124_v23  ;;  %v395_v23 = vld [vmem:[#allocation6 + $0x7f8] sm:$0xff] }
 0x160   :  { %1991 = vmatprep.subr.bf16.mxu1 %v3133_v25  ;;  %v3188_v25 = vcombine.low %v383_v12, %v387_v13  ;;  %v3197_v27 = vcombine.high %v391_v22, %v395_v23  ;;  %v3196_v54 = vcombine.low %v391_v22, %v395_v23  ;;  %v3421_v3 = vld [vmem:[#allocation9 + $0x30] sm:$0xff]   ;;  %v3423_v13 = vld [vmem:[#allocation9 + $0x38] sm:$0xff]   ;;  %v3442_v23 = vld [vmem:[#allocation9 + $0x148] sm:$0xff]  }
 0x161   :  { %1951 = vmatpush1.bf16.msra.mxu0 %v3004_v28  ;;  %v3408_v28 = vld [vmem:[#allocation9 + $0x40] sm:$0xff]  }
 0x162   :  { %1952 = vmatprep.subr.bf16.mxu0 %v3013_v30  ;;  %v3409_v30 = vld [vmem:[#allocation9] sm:$0xff]  }
 0x163   :  { %1992 = vmatpush1.bf16.msra.mxu1 %v3132_v29  ;;  %v3424_v29 = vld [vmem:[#allocation9 + $0xc0] sm:$0xff]  }
 0x164   :  { %1993 = vmatprep.subr.bf16.mxu1 %v3141_v31  ;;  %v3410_v31 = vld [vmem:[#allocation9 + $0x48] sm:$0xff]  }
 0x165   :  { %1953 = vmatpush1.bf16.msra.mxu0 %v3012_v36  ;;  %v3427_v36 = vld [vmem:[#allocation9 + $0x88] sm:$0xff]  }
 0x166   :  { %1954 = vmatprep.subr.bf16.mxu0 %v3021_v38  ;;  %v3413_v38 = vld [vmem:[#allocation9 + $0x10] sm:$0xff]  }
 0x167   :  { %1994 = vmatpush1.bf16.msra.mxu1 %v3140_v37  ;;  %v3428_v37 = vld [vmem:[#allocation9 + $0xd0] sm:$0xff]  }
 0x168   :  { %1995 = vmatprep.subr.bf16.mxu1 %v3149_v39  ;;  %v3414_v39 = vld [vmem:[#allocation9 + $0x58] sm:$0xff]  }
 0x169   :  { %1955 = vmatpush1.bf16.msra.mxu0 %v3020_v44  ;;  %v3870_v44 = vshrl.u32 %v2047_v41, 7 }
 0x16a   :  { %1956 = vmatprep.subr.bf16.mxu0 %v3029_v46  ;;  %v3417_v46 = vld [vmem:[#allocation9 + $0x20] sm:$0xff]  }
 0x16b   :  { %1996 = vmatpush1.bf16.msra.mxu1 %v3148_v45  ;;  %v3432_v45 = vld [vmem:[#allocation9 + $0xe0] sm:$0xff]   ;;  %v2049_v49 = vsub.s32 0, %v3870_v44 }
 0x16c   :  { %1997 = vmatprep.subr.bf16.mxu1 %v3157_v47  ;;  %v3418_v47 = vld [vmem:[#allocation9 + $0x68] sm:$0xff]  }
 0x16d   :  { %1957 = vmatpush1.bf16.msra.mxu0 %v3028_v52  ;;  %v2053_v52 = vsub.s32 1, %v3870_v44  ;;  %v2050_v61 = vrot.slane %v3873_v51, %v2049_v49 }
 0x16e   :  { %1958 = vmatprep.subr.bf16.mxu0 %v3037_v56  ;;  %v3420_v56 = vld [vmem:[#allocation9 + $0x70] sm:$0xff]  }
 0x16f   :  { %1998 = vmatpush1.bf16.msra.mxu1 %v3156_v55  ;;  %v3419_v55 = vld [vmem:[#allocation9 + $0x28] sm:$0xff]  }
 0x170   :  { %1999 = vmatprep.subr.bf16.mxu1 %v3165_v57  ;;  %v3435_v57 = vld [vmem:[#allocation9 + $0xa8] sm:$0xff]  }
 0x171   :  { %1959 = vmatpush1.bf16.msra.mxu0 %v3036_v63 }
 0x172   :  { %1960 = vmatprep.subr.bf16.mxu0 %v3045_v0 }
 0x173   :  { %2000 = vmatpush1.bf16.msra.mxu1 %v3164_v59  ;;  %v2054_v59 = vrot.slane %v3873_v51, %v2053_v52 }
 0x174   :  { %2001 = vmatprep.subr.bf16.mxu1 %v3173_v1 }
 0x175   :  { %1961 = vmatpush1.bf16.msra.mxu0 %v3044_v6 }
 0x176   :  { %1962 = vmatprep.subr.bf16.mxu0 %v3053_v8  ;;  %v3437_v8 = vld [vmem:[#allocation9 + $0xb0] sm:$0xff]  }
 0x177   :  { %2002 = vmatpush1.bf16.msra.mxu1 %v3172_v7  ;;  %v3422_v7 = vld [vmem:[#allocation9 + $0x78] sm:$0xff]  }
 0x178   :  { %2003 = vmatprep.subr.bf16.mxu1 %v3181_v9 }
 0x179   :  { %1963 = vmatpush1.bf16.msra.mxu0 %v3052_v14 }
 0x17a   :  { %1964 = vmatprep.subr.bf16.mxu0 %v3061_v17  ;;  %v3439_v17 = vld [vmem:[#allocation9 + $0xb8] sm:$0xff]  }
 0x17b   :  { %2004 = vmatpush1.bf16.msra.mxu1 %v3180_v15 }
 0x17c   :  { %2005 = vmatprep.subr.bf16.mxu1 %v3189_v18  ;;  %v3440_v18 = vld [vmem:[#allocation9 + $0x140] sm:$0xff]  }
 0x17d   :  { %1965 = vmatpush1.bf16.msra.mxu0 %v3060_v24  ;;  %v3456_v24 = vld [vmem:[#allocation9 + $0x1c0] sm:$0xff]  }
 0x17e   :  { %1966 = vmatprep.subr.bf16.mxu0 %v3069_v26  ;;  %v3444_v26 = vld [vmem:[#allocation9 + $0x150] sm:$0xff]  }
 0x17f   :  { %2006 = vmatpush1.bf16.msra.mxu1 %v3188_v25  ;;  %v3443_v25 = vld [vmem:[#allocation9 + $0x108] sm:$0xff]  }
 0x180   :  { %2007 = vmatprep.subr.bf16.mxu1 %v3197_v27  ;;  %v3445_v27 = vld [vmem:[#allocation9 + $0x110] sm:$0xff]  }
 0x181   :  { %1967 = vmatpush1.bf16.msra.mxu0 %v3068_v53  ;;  %v3446_v53 = vld [vmem:[#allocation9 + $0x158] sm:$0xff]  }
 0x182   :  { %3272 = vmatprep.subr.bf16.mxu0 %v3408_v28  ;;  %v3448_v28 = vld [vmem:[#allocation9 + $0x160] sm:$0xff]  }
 0x183   :  { %2008 = vmatpush1.bf16.msra.mxu1 %v3196_v54  ;;  %v3447_v54 = vld [vmem:[#allocation9 + $0x118] sm:$0xff]  }
 0x184   :  { %3294 = vmatprep.subr.bf16.mxu1 %v3424_v29  ;;  %1969 = vmatmul.mubr.bf16.vlgmr.msra.gmra.mrb[12].mxu0 %v3850_v16  ;;  %v3415_v16 = vld [vmem:[#allocation9 + $0x18] sm:$0xff]   ;;  %v3449_v29 = vld [vmem:[#allocation9 + $0x120] sm:$0xff]  }
 0x185   :  { %3273 = vmatpush3.bf16.msra.mxu0 %v3409_v30  ;;  %v3450_v30 = vld [vmem:[#allocation9 + $0x168] sm:$0xff]  }
 0x186   :  { %2010 = vmatmul.mubr.bf16.vlgmr.msra.gmra.mrb[12].mxu1 %v3854_v19  ;;  %3274 = vmatprep.subr.bf16.mxu0 %v3410_v31  ;;  %v3416_v19 = vld [vmem:[#allocation9 + $0x60] sm:$0xff]   ;;  %v3451_v31 = vld [vmem:[#allocation9 + $0x128] sm:$0xff]  }
 0x187   :  { %3295 = vmatpush3.bf16.msra.mxu1 %v3425_v32  ;;  %v3452_v32 = vld [vmem:[#allocation9 + $0x170] sm:$0xff]  }
 0x188   :  { %3296 = vmatprep.subr.bf16.mxu1 %v3426_v33  ;;  %v3453_v33 = vld [vmem:[#allocation9 + $0x130] sm:$0xff]  }
 0x189   :  { %3275 = vmatpush3.bf16.msra.mxu0 %v3411_v34  ;;  %v3454_v34 = vld [vmem:[#allocation9 + $0x178] sm:$0xff]  }
 0x18a   :  { %3276 = vmatprep.subr.bf16.mxu0 %v3412_v35  ;;  %v3455_v35 = vld [vmem:[#allocation9 + $0x138] sm:$0xff]  }
 0x18b   :  { %3297 = vmatpush3.bf16.msra.mxu1 %v3427_v36  ;;  %v2057_v36 = vsub.s32 2, %v3870_v44 }
 0x18c   :  { %3298 = vmatprep.subr.bf16.mxu1 %v3428_v37  ;;  %v2061_v37 = vsub.s32 3, %v3870_v44 }
 0x18d   :  { %3277 = vmatpush3.bf16.msra.mxu0 %v3413_v38 }
 0x18e   :  { %3278 = vmatprep.subr.bf16.mxu0 %v3414_v39  ;;  %v2058_v39 = vrot.slane %v3873_v51, %v2057_v36 }
 0x18f   :  { %3299 = vmatpush3.bf16.msra.mxu1 %v3429_v40 }
 0x190   :  { %3300 = vmatprep.subr.bf16.mxu1 %v3430_v42  ;;  %v2062_v42 = vrot.slane %v3873_v51, %v2061_v37 }
 0x191   :  { %3279 = vmatpush3.bf16.msra.mxu0 %v3415_v16 }
 0x192   :  { %3280 = vmatprep.subr.bf16.mxu0 %v3416_v19 }
 0x193   :  { %3301 = vmatpush3.bf16.msra.mxu1 %v3431_v43 }
 0x194   :  { %3302 = vmatprep.subr.bf16.mxu1 %v3432_v45 }
 0x195   :  { %3281 = vmatpush3.bf16.msra.mxu0 %v3417_v46 }
 0x196   :  { %3282 = vmatprep.subr.bf16.mxu0 %v3418_v47 }
 0x197   :  { %3303 = vmatpush3.bf16.msra.mxu1 %v3433_v48  ;;  %v1724_v60 = vpop.f32.mrb[0].mxu0 }
 0x198   :  { %3304 = vmatprep.subr.bf16.mxu1 %v3434_v50  ;;  %v1726_v63 = vpop.f32.mrb[1].mxu0 }
 0x199   :  { %v1765_v58 = vpop.f32.mrb[0].mxu1  ;;  %v1728_v2 = vpop.f32.mrb[2].mxu0  ;;  %3283 = vmatpush3.bf16.msra.mxu0 %v3419_v55 }
 0x19a   :  { %v1766_v0 = vadd.f32 %v1765_v58, %v1724_v60  ;;  %v1767_v1 = vpop.f32.mrb[1].mxu1  ;;  %v1729_v6 = vpop.f32.mrb[3].mxu0  ;;  %3284 = vmatprep.subr.bf16.mxu0 %v3420_v56  ;;  %v3457_v60 = vld [vmem:[#allocation9 + $0x180] sm:$0xff]   ;;  %v3460_v58 = vld [vmem:[#allocation9 + $0x1d0] sm:$0xff]  }
 0x19b   :  { %v1768_v4 = vadd.f32 %v1767_v1, %v1726_v63  ;;  %v1769_v5 = vpop.f32.mrb[2].mxu1  ;;  %3305 = vmatpush3.bf16.msra.mxu1 %v3435_v57  ;;  %v3461_v63 = vld [vmem:[#allocation9 + $0x190] sm:$0xff]   ;;  %v3464_v1 = vld [vmem:[#allocation9 + $0x1e0] sm:$0xff]  }
 0x19c   :  { %v2087_v9 = vadd.f32 %v2050_v61, %v1766_v0  ;;  %v1770_v10 = vpop.f32.mrb[3].mxu1  ;;  %3306 = vmatprep.subr.bf16.mxu1 %v3436_v62  ;;  %v3458_v61 = vld [vmem:[#allocation9 + $0x1c8] sm:$0xff]   ;;  %v3463_v0 = vld [vmem:[#allocation9 + $0x198] sm:$0xff]   ;;  %v3465_v2 = vld [vmem:[#allocation9 + $0x1a0] sm:$0xff]  }
 0x19d   :  { %v2088_v12 = vadd.f32 %v2054_v59, %v1768_v4  ;;  %3285 = vmatpush3.bf16.msra.mxu0 %v3421_v3  ;;  %v3459_v62 = vld [vmem:[#allocation9 + $0x188] sm:$0xff]   ;;  %v3462_v59 = vld [vmem:[#allocation9 + $0x1d8] sm:$0xff]   ;;  %v3468_v5 = vld [vmem:[#allocation9 + $0x1f0] sm:$0xff]   ;;  %v2069_v10 = vsub.s32 5, %v3870_v44 }
 0x19e   :  { %v2095_v14 = vmax.f32 %v2087_v9, 0.0  ;;  %3286 = vmatprep.subr.bf16.mxu0 %v3422_v7  ;;  %v3466_v3 = vld [vmem:[#allocation9 + $0x1e8] sm:$0xff]   ;;  %v3469_v6 = vld [vmem:[#allocation9 + $0x1b0] sm:$0xff]   ;;  %v3470_v7 = vld [vmem:[#allocation9 + $0x1f8] sm:$0xff]   ;;  %v2065_v9 = vsub.s32 4, %v3870_v44 }
 0x19f   :  { %v2096_v15 = vmax.f32 %v2088_v12, 0.0  ;;  %3307 = vmatpush3.bf16.msra.mxu1 %v3437_v8  ;;  %v3467_v4 = vld [vmem:[#allocation9 + $0x1a8] sm:$0xff]   ;;  %v3471_v8 = vld [vmem:[#allocation9 + $0x1b8] sm:$0xff]  }
 0x1a0   :  { %3308 = vmatprep.subr.bf16.mxu1 %v3438_v11  ;;  %v2103_v22 = vpack.c.bf16 %v2095_v14, %v2095_v14  ;;  %v2066_v12 = vrot.slane %v3873_v51, %v2065_v9 }
 0x1a1   :  { %v2104_v20 = vpack.c.bf16 %v2096_v15, %v2096_v15  ;;  %3287 = vmatpush3.bf16.msra.mxu0 %v3423_v13  ;;  %v2070_v15 = vrot.slane %v3873_v51, %v2069_v10 }
 0x1a2   :  { %3316 = vmatprep.subr.bf16.mxu0 %v3440_v18 }
 0x1a3   :  { %2662 = vmatprep.mubr.bf16.mxu0 %v2104_v20  ;;  %3309 = vmatpush3.bf16.msra.mxu1 %v3439_v17 }
 0x1a4   :  { %2663 = vmatmul.mubr.bf16.vlgmr.msra.gmra.mrb[16].mxu0 %v2103_v22  ;;  %3338 = vmatprep.subr.bf16.mxu1 %v3456_v24 }
 0x1a5   :  { %3317 = vmatpush3.bf16.msra.mxu0 %v3441_v21 }
 0x1a6   :  { %3318 = vmatprep.subr.bf16.mxu0 %v3442_v23 }
 0x1a9   :  { %3319 = vmatpush3.bf16.msra.mxu0 %v3443_v25 }
 0x1aa   :  { %3320 = vmatprep.subr.bf16.mxu0 %v3444_v26 }
 0x1ad   :  { %3321 = vmatpush3.bf16.msra.mxu0 %v3445_v27 }
 0x1ae   :  { %3322 = vmatprep.subr.bf16.mxu0 %v3446_v53 }
 0x1b1   :  { %3323 = vmatpush3.bf16.msra.mxu0 %v3447_v54 }
 0x1b2   :  { %3324 = vmatprep.subr.bf16.mxu0 %v3448_v28 }
 0x1b5   :  { %3325 = vmatpush3.bf16.msra.mxu0 %v3449_v29  ;;  %v2073_v29 = vsub.s32 6, %v3870_v44 }
 0x1b6   :  { %3326 = vmatprep.subr.bf16.mxu0 %v3450_v30  ;;  %v2077_v30 = vsub.s32 7, %v3870_v44 }
 0x1b9   :  { %3327 = vmatpush3.bf16.msra.mxu0 %v3451_v31 }
 0x1ba   :  { %3328 = vmatprep.subr.bf16.mxu0 %v3452_v32  ;;  %v2074_v32 = vrot.slane %v3873_v51, %v2073_v29 }
 0x1bd   :  { %3329 = vmatpush3.bf16.msra.mxu0 %v3453_v33 }
 0x1be   :  { %3330 = vmatprep.subr.bf16.mxu0 %v3454_v34 }
 0x1c1   :  { %3331 = vmatpush3.bf16.msra.mxu0 %v3455_v35  ;;  %v2078_v35 = vrot.slane %v3873_v51, %v2077_v30 }
 0x1d7   :  { %v1806_v38 = vpop.f32.mrb[4].mxu0 }
 0x1d8   :  { %v1808_v41 = vpop.f32.mrb[5].mxu0 }
 0x1d9   :  { %v1847_v40 = vpop.f32.mrb[4].mxu1  ;;  %v1810_v43 = vpop.f32.mrb[6].mxu0 }
 0x1da   :  { %v1848_v16 = vadd.f32 %v1847_v40, %v1806_v38  ;;  %v1849_v19 = vpop.f32.mrb[5].mxu1  ;;  %v1811_v47 = vpop.f32.mrb[7].mxu0 }
 0x1db   :  { %v1850_v45 = vadd.f32 %v1849_v19, %v1808_v41  ;;  %v1851_v46 = vpop.f32.mrb[6].mxu1 }
 0x1dc   :  { %v2089_v48 = vadd.f32 %v2058_v39, %v1848_v16  ;;  %v1852_v49 = vpop.f32.mrb[7].mxu1 }
 0x1dd   :  { %v2090_v50 = vadd.f32 %v2062_v42, %v1850_v45 }
 0x1de   :  { %v2097_v52 = vmax.f32 %v2089_v48, 0.0 }
 0x1df   :  { %v2098_v55 = vmax.f32 %v2090_v50, 0.0 }
 0x1e0   :  { %v2105_v56 = vpack.c.bf16 %v2097_v52, %v2097_v52  ;;  %v3472_v52 = vld [vmem:[#allocation12] sm:$0xff]  }
 0x1e1   :  { %v2106_v57 = vpack.c.bf16 %v2098_v55, %v2098_v55  ;;  %v3701_v55 = vmov 0.0  }
 0x1e2   :  { %3369 = vmatprep.subr.bf16.mxu0 %v3701_v55 }
 0x1e3   :  { %2702 = vmatprep.mubr.bf16.mxu1 %v2106_v57  ;;  %v3474_v57 = vld [vmem:[#allocation12 + $0x10] sm:$0xff]  }
 0x1e4   :  { %2703 = vmatmul.mubr.bf16.vlgmr.msra.gmra.mrb[16].mxu1 %v2105_v56  ;;  %v3473_v56 = vld [vmem:[#allocation12 + $0x8] sm:$0xff]  }
 0x1e5   :  { %3339 = vmatpush3.bf16.msra.mxu1 %v3457_v60  ;;  %v3475_v60 = vld [vmem:[#allocation12 + $0x18] sm:$0xff]  }
 0x1e6   :  { %3340 = vmatprep.subr.bf16.mxu1 %v3458_v61  ;;  %v3476_v61 = vld [vmem:[#allocation12 + $0x20] sm:$0xff]  }
 0x1e9   :  { %3341 = vmatpush3.bf16.msra.mxu1 %v3459_v62  ;;  %v3477_v62 = vld [vmem:[#allocation12 + $0x28] sm:$0xff]  }
 0x1ea   :  { %3342 = vmatprep.subr.bf16.mxu1 %v3460_v58  ;;  %v3198_v58 = vld [vmem:[#allocation11] ss:$0 sm:$0xff] }
 0x1ed   :  { %3343 = vmatpush3.bf16.msra.mxu1 %v3461_v63 }
 0x1ee   :  { %3344 = vmatprep.subr.bf16.mxu1 %v3462_v59 }
 0x1f1   :  { %3345 = vmatpush3.bf16.msra.mxu1 %v3463_v0  ;;  %v3478_v0 = vld [vmem:[#allocation12 + $0x30] sm:$0xff]  }
 0x1f2   :  { %3346 = vmatprep.subr.bf16.mxu1 %v3464_v1 }
 0x1f5   :  { %3347 = vmatpush3.bf16.msra.mxu1 %v3465_v2 }
 0x1f6   :  { %3348 = vmatprep.subr.bf16.mxu1 %v3466_v3 }
 0x1f9   :  { %3349 = vmatpush3.bf16.msra.mxu1 %v3467_v4 }
 0x1fa   :  { %3350 = vmatprep.subr.bf16.mxu1 %v3468_v5 }
 0x1fd   :  { %3351 = vmatpush3.bf16.msra.mxu1 %v3469_v6  ;;  %v3479_v6 = vld [vmem:[#allocation12 + $0x38] sm:$0xff]  }
 0x1fe   :  { %3352 = vmatprep.subr.bf16.mxu1 %v3470_v7 }
 0x201   :  { %3353 = vmatpush3.bf16.msra.mxu1 %v3471_v8 }
 0x217   :  { %v1888_v11 = vpop.f32.mrb[8].mxu0 }
 0x218   :  { %v1890_v14 = vpop.f32.mrb[9].mxu0 }
 0x219   :  { %v1929_v13 = vpop.f32.mrb[8].mxu1  ;;  %v1892_v20 = vpop.f32.mrb[10].mxu0 }
 0x21a   :  { %v1930_v17 = vadd.f32 %v1929_v13, %v1888_v11  ;;  %v1931_v18 = vpop.f32.mrb[9].mxu1  ;;  %v1893_v23 = vpop.f32.mrb[11].mxu0 }
 0x21b   :  { %v1932_v21 = vadd.f32 %v1931_v18, %v1890_v14  ;;  %v1933_v22 = vpop.f32.mrb[10].mxu1 }
 0x21c   :  { %v2091_v24 = vadd.f32 %v2066_v12, %v1930_v17  ;;  %v1934_v25 = vpop.f32.mrb[11].mxu1 }
 0x21d   :  { %v2092_v26 = vadd.f32 %v2070_v15, %v1932_v21 }
 0x21e   :  { %v2099_v27 = vmax.f32 %v2091_v24, 0.0 }
 0x21f   :  { %v2100_v53 = vmax.f32 %v2092_v26, 0.0 }
 0x220   :  { %v2107_v54 = vpack.c.bf16 %v2099_v27, %v2099_v27 }
 0x221   :  { %v2108_v28 = vpack.c.bf16 %v2100_v53, %v2100_v53 }
 0x223   :  { %2742 = vmatprep.mubr.bf16.mxu0 %v2108_v28 }
 0x224   :  { %2743 = vmatmul.mubr.bf16.vlgmr.msra.gmra.mrb[20].mxu0 %v2107_v54 }
 0x225   :  { %3370 = vmatpush3.bf16.msra.mxu0 %v3472_v52  ;;  %3385 = vmatprep.mubr.msk.bf16.mxu0 %vm3702_vm0, %v3701_v55 }
 0x226   :  { %3371 = vmatprep.subr.bf16.mxu0 %v3701_v55 }
 0x229   :  { %3372 = vmatpush3.bf16.msra.mxu0 %v3473_v56 }
 0x22a   :  { %3373 = vmatprep.subr.bf16.mxu0 %v3701_v55 }
 0x22d   :  { %3374 = vmatpush3.bf16.msra.mxu0 %v3474_v57 }
 0x22e   :  { %3375 = vmatprep.subr.bf16.mxu0 %v3701_v55 }
 0x231   :  { %3376 = vmatpush3.bf16.msra.mxu0 %v3475_v60 }
 0x232   :  { %3377 = vmatprep.subr.bf16.mxu0 %v3701_v55 }
 0x235   :  { %3378 = vmatpush3.bf16.msra.mxu0 %v3476_v61 }
 0x236   :  { %3379 = vmatprep.subr.bf16.mxu0 %v3701_v55 }
 0x239   :  { %3380 = vmatpush3.bf16.msra.mxu0 %v3477_v62 }
 0x23a   :  { %3381 = vmatprep.subr.bf16.mxu0 %v3701_v55 }
 0x23d   :  { %3382 = vmatpush3.bf16.msra.mxu0 %v3478_v0 }
 0x23e   :  { %3383 = vmatprep.subr.bf16.mxu0 %v3701_v55 }
 0x241   :  { %3384 = vmatpush3.bf16.msra.mxu0 %v3479_v6 }
 0x257   :  { %v1970_v31 = vpop.f32.mrb[12].mxu0 }
 0x258   :  { %v1972_v34 = vpop.f32.mrb[13].mxu0 }
 0x259   :  { %v2011_v33 = vpop.f32.mrb[12].mxu1  ;;  %v1974_v38 = vpop.f32.mrb[14].mxu0 }
 0x25a   :  { %v2012_v36 = vadd.f32 %v2011_v33, %v1970_v31  ;;  %v2013_v37 = vpop.f32.mrb[13].mxu1  ;;  %v1975_v41 = vpop.f32.mrb[15].mxu0 }
 0x25b   :  { %v2014_v39 = vadd.f32 %v2013_v37, %v1972_v34  ;;  %v2015_v40 = vpop.f32.mrb[14].mxu1 }
 0x25c   :  { %v2093_v42 = vadd.f32 %v2074_v32, %v2012_v36  ;;  %v2016_v16 = vpop.f32.mrb[15].mxu1 }
 0x25d   :  { %v2094_v19 = vadd.f32 %v2078_v35, %v2014_v39 }
 0x25e   :  { %v2101_v43 = vmax.f32 %v2093_v42, 0.0 }
 0x25f   :  { %v2102_v45 = vmax.f32 %v2094_v19, 0.0 }
 0x260   :  { %v2109_v44 = vpack.c.bf16 %v2101_v43, %v2101_v43 }
 0x261   :  { %v2110_v46 = vpack.c.bf16 %v2102_v45, %v2102_v45 }
 0x263   :  { %2782 = vmatprep.mubr.bf16.mxu1 %v2110_v46 }
 0x264   :  { %2783 = vmatmul.mubr.bf16.vlgmr.msra.gmra.mrb[20].mxu1 %v2109_v44 }
 0x277   :  { %v3288_v47 = vpop.f32.mrb[16].mxu0 }
 0x278   :  { %v3289_v48 = vpop.f32.mrb[17].mxu0 }
 0x279   :  { %v3290_v49 = vadd.f32 %v3289_v48, %v3288_v47  ;;  %v3291_v50 = vpop.f32.mrb[18].mxu0 }
 0x27a   :  { %v3292_v51 = vpop.f32.mrb[19].mxu0 }
 0x27b   :  { %v2665_v1 = vadd.f32 %v3290_v49, %v3198_v58 }
 0x2b7   :  { %v3310_v63 = vpop.f32.mrb[16].mxu1 }
 0x2b8   :  { %v3311_v59 = vpop.f32.mrb[17].mxu1 }
 0x2b9   :  { %v3312_v2 = vadd.f32 %v3311_v59, %v3310_v63  ;;  %v3313_v3 = vpop.f32.mrb[18].mxu1 }
 0x2ba   :  { %v3314_v4 = vpop.f32.mrb[19].mxu1 }
 0x2bb   :  { %v2705_v5 = vadd.f32 %v3312_v2, %v2665_v1 }
 0x2f7   :  { %v3332_v7 = vpop.f32.mrb[20].mxu0 }
 0x2f8   :  { %v3333_v8 = vpop.f32.mrb[21].mxu0 }
 0x2f9   :  { %v3334_v9 = vadd.f32 %v3333_v8, %v3332_v7  ;;  %v3335_v10 = vpop.f32.mrb[22].mxu0 }
 0x2fa   :  { %v3336_v11 = vpop.f32.mrb[23].mxu0 }
 0x2fb   :  { %v2745_v12 = vadd.f32 %v3334_v9, %v2705_v5 }
 0x337   :  { %v3354_v13 = vpop.f32.mrb[20].mxu1 }
 0x338   :  { %v3355_v14 = vpop.f32.mrb[21].mxu1 }
 0x339   :  { %v3356_v15 = vadd.f32 %v3355_v14, %v3354_v13  ;;  %v3357_v17 = vpop.f32.mrb[22].mxu1 }
 0x33a   :  { %v3358_v18 = vpop.f32.mrb[23].mxu1 }
 0x33b   :  { %v2785_v20 = vadd.f32 %v3356_v15, %v2745_v12 }
 0x33d   :  { %v2790_v21 = vmax.f32 %v2785_v20, 0.0 }
 0x33f   :  { %v2791_v22 = vpack.c.bf16 %v2790_v21, %v2790_v21 }
 0x341   :  { %2792 = vst [vmem:[#allocation15] sm:$0xf] %v2791_v22  ;;  %3386 = vmatmul.mubr.bf16.vlgmr.msra.gmra.mrb[24].mxu0 %v2791_v22 }
 0x342   :  { %3645 = shalt.err (!%p3642_p4)
}
 0x343   :  { %s3646_s20 = scalar_lea.hbm %s3921_s7, 64 }
 0x344   :  { %p3647_p5 = scmp.ne.s32.totalorder %s3921_s7, %s3646_s20  ;;  %p3650_p6 = scmp.lt.u32.totalorder %s3646_s20, %s3921_s7 }
 0x346   :  { %p3652_p7 = pnand %p3650_p6, %p3647_p5 }
 0x348   :  { %3655 = shalt.err (!%p3652_p7)
}
 0x349   :  { %2915 = dma.vmem_to_hbm [thread:$0]  %s2913_s21, 64, %s3921_s7, [#allocation5]   ;;  %v3263_v23 = vld [vmem:[#allocation14] ss:$0 sm:$0xff] }
 0x34a   :  { %s3704_s29 = smov [#allocation16]  }
 0x34b   :  { %s2922_s30 = sshll.u32 %s3704_s29, 4  ;;  %s2923_s30 = int_to_ptr.vmem [resolvable:$true] %s2922_s30 }
 0x34c   :  { %s3656_s2 = scalar_lea.vmem %s2923_s30, 128  ;;  %p3661_p9 = scmp.lt.s32.totalorder %s2923_s30, %s2923_s30 }
 0x34d   :  { %p3657_p8 = scmp.ne.s32.totalorder %s2923_s30, %s3656_s2  ;;  %p3662_p10 = scmp.lt.s32.totalorder %s3656_s2, %s3656_s2 }
 0x34f   :  { %p3663_p11 = por %p3662_p10, %p3661_p9 }
 0x351   :  { %p3664_p12 = pnand %p3663_p11, %p3657_p8 }
 0x414   :  { %v2898_v24 = vpop.f32.mrb[24].mxu0 }
 0x415   :  { %v2899_v25 = vadd.f32 %v3263_v23, %v2898_v24  ;;  %v3387_v26 = vpop.f32.mrb[25].mxu0 }
 0x416   :  { %v2901_v27 = vpop.f32.mrb[26].mxu0 }
 0x417   :  { %v2904_v53 = vmax.f32 %v2899_v25, 0.0  ;;  %v3388_v54 = vpop.f32.mrb[27].mxu0 }
 0x419   :  { %2905 = vst [vmem:[#allocation16] sm:$0xff] %v2904_v53 }
 0x41a   :  { %3667 = shalt.err (!%p3664_p12)
}
 0x41b   :  { %s3668_s5 = scalar_lea.hbm %s3922_s8, 128 }
 0x41c   :  { %p3669_p13 = scmp.ne.s32.totalorder %s3922_s8, %s3668_s5  ;;  %p3672_p0 = scmp.lt.u32.totalorder %s3668_s5, %s3922_s8 }
 0x41e   :  { %p3674_p1 = pnand %p3672_p0, %p3669_p13 }
 0x420   :  { %3677 = shalt.err (!%p3674_p1)
}
 0x421   :  { %2925 = dma.vmem_to_hbm [thread:$0]  %s2923_s30, 128, %s3922_s8, [#allocation17]  }
 0x422   :  { %3686 = dma.done.wait [#allocation5], 64  }
 0x423   :  { %3687 = vsyncadd [#allocation5], 4294967232 }
 0x424   :  { %3688 = dma.done.wait [#allocation17], 128  }
 0x425   :  { %3689 = vsyncadd [#allocation17], 4294967168 }
 0x426   :  { %2932 = vsyncpa [#allocation4], 1 }
 0x427   :  { %2933 = vsyncpa [#allocation7], 1 }
 0x428   :  { %2934 = vsyncpa [#allocation10], 1 }
 0x429   :  { %2935 = vsyncpa [#allocation13], 1 }
 0x42a   :  { %2936 = vsyncpa [#allocation5], 1 }
 0x42b   :  { %2937 = vsyncpa [#allocation17], 1 }

</bundles_post_ra>
